<compile_context>
chip_gen: v7x
topology: tpu7x:2x2x1
jax: 0.10.0
libtpu: 0.0.40
codegen_flags: <defaults>
</compile_context>

<pallas_src>
import functools

import numpy as np
import jax
import jax.numpy as jnp
from jax import lax
from jax.experimental import pallas as pl
from jax.experimental.pallas import tpu as pltpu

_BN_EPS = 1e-5
_GATE = -1e9  # added before the ReLU6 clip -> forces halo positions to exactly 0


def _round_up(a, m):
    return (a + m - 1) // m * m


def _pick_hid_chunk(hid_pad, target):
    """Largest multiple-of-128 divisor of hid_pad that is <= max(target, 128)."""
    target = max(128, (target // 128) * 128)
    best, d = 128, 128
    while d <= min(hid_pad, target):
        if hid_pad % d == 0:
            best = d
        d += 128
    return best


def _default_dw_dtype():
    # bf16 VALU exists on v6e / v7x; keep f32 on v5e and older (and unknown chips).
    try:
        kind = jax.devices()[0].device_kind.lower()
    except Exception:
        return jnp.float32
    return jnp.bfloat16 if ("v6" in kind or "v7" in kind) else jnp.float32


# --------------------------------------------------------------------------- #
# In-kernel helpers
# --------------------------------------------------------------------------- #
def _expand_relu6(x_tile, w1_ref, b1_ref, gate, dw_dtype):
    """1x1 expand (+ folded-BN bias) + boundary gate + ReLU6 for one hid chunk."""
    rows, cols, cin = x_tile.shape
    chunk = w1_ref.shape[1]
    y = jnp.dot(x_tile.reshape(rows * cols, cin).astype(jnp.bfloat16),
                w1_ref[...], preferred_element_type=jnp.float32)
    y = y.reshape(rows, cols, chunk)
    y = jnp.clip(y + b1_ref[...] + gate, 0.0, 6.0)
    return y.astype(dw_dtype)


def _project_and_store(y2, w3_ref, b3_ref, xid_ref, out_ref, acc_ref,
                       th_out, w_out_pad, n_chunks, identity):
    """Partial 1x1 project for this hid chunk; accumulate + finalize output."""
    chunk = y2.shape[-1]
    oup_pad = out_ref.shape[3]
    y3 = jnp.dot(y2.reshape(th_out * w_out_pad, chunk).astype(jnp.bfloat16),
                 w3_ref[...], preferred_element_type=jnp.float32)
    y3 = y3.reshape(th_out, w_out_pad, oup_pad)

    def finalize(partial):
        res = partial + b3_ref[...]
        if identity:
            res = res + xid_ref[0]
        out_ref[0] = res.astype(out_ref.dtype)

    if n_chunks == 1:
        finalize(y3)
    else:
        c = pl.program_id(2)

        @pl.when(c == 0)
        def _():
            acc_ref[...] = y3

        @pl.when(c > 0)
        def _():
            acc_ref[...] += y3

        @pl.when(c == n_chunks - 1)
        def _():
            finalize(acc_ref[...])


# --------------------------------------------------------------------------- #
# Stride-1 kernel: expand -> 3x3 depthwise -> project (+ identity add)
# x_ref holds the whole zero-padded image for this batch element (resident
# across the row-tile and hid-chunk axes); each step does th_out output rows
# for one hid chunk.
# --------------------------------------------------------------------------- #
def _stride1_kernel(*refs, th_out, has_expand, identity, n_chunks, h, w, dw_dtype):
    it = iter(refs)
    x_ref = next(it)
    w1_ref = next(it) if has_expand else None
    b1_ref = next(it) if has_expand else None
    wd_ref = next(it)
    b2_ref = next(it)
    w3_ref = next(it)
    b3_ref = next(it)
    xid_ref = next(it) if identity else None
    out_ref = next(it)
    acc_ref = next(it) if n_chunks > 1 else None

    w_out_pad = out_ref.shape[2]
    th_in = th_out + 2                       # 1-row halo on each side
    wp = x_ref.shape[2]

    row0 = pl.multiple_of(pl.program_id(1) * th_out, th_out)
    x_tile = x_ref[0, pl.ds(row0, th_in), :, :]           # (th_in, wp, cin)

    if has_expand:
        # Cheap (rows, cols, 1) gate instead of a full-tile select: the real
        # module zero-pads AFTER the expand, so halo / alignment positions must
        # come out of the ReLU6 as exact zeros.
        rows = row0 + lax.broadcasted_iota(jnp.int32, (th_in, wp, 1), 0)
        cols = lax.broadcasted_iota(jnp.int32, (th_in, wp, 1), 1)
        keep = (rows >= 1) & (rows <= h) & (cols >= 1) & (cols <= w)
        gate = jnp.where(keep, jnp.float32(0), jnp.float32(_GATE))
        y1 = _expand_relu6(x_tile, w1_ref, b1_ref, gate, dw_dtype)
    else:
        y1 = x_tile.astype(dw_dtype)         # halo already exact zeros

    # 3x3 depthwise: one W-axis slice per kw (aligned extent = w_out_pad), the
    # per-kh slices are along the cheap leading axis.  BN scale already folded.
    ycols = [y1[:, kw:kw + w_out_pad, :] for kw in range(3)]
    acc = ycols[0][0:th_out] * wd_ref[0, 0, :]
    for kh in range(3):
        for kw in range(3):
            if kh == 0 and kw == 0:
                continue
            acc = acc + ycols[kw][kh:kh + th_out] * wd_ref[kh, kw, :]
    y2 = jnp.clip(acc.astype(jnp.float32) + b2_ref[...], 0.0, 6.0)

    _project_and_store(y2, w3_ref, b3_ref, xid_ref, out_ref, acc_ref,
                       th_out, w_out_pad, n_chunks, identity)


# --------------------------------------------------------------------------- #
# Stride-2 kernel.  The wrapper pre-splits the zero-padded image into the four
# even/odd (row, col) phases (stacked on a leading axis); output (t, u) needs
# padded input (2t+kh, 2u+kw), so every tap is a unit-stride slice of the right
# phase.  All four phases go through ONE fused expand matmul.
# --------------------------------------------------------------------------- #
def _stride2_kernel(*refs, th_out, has_expand, n_chunks, h, w, dw_dtype):
    it = iter(refs)
    x_ref = next(it)                          # (1, 4, rows_ph, wp2, cin)
    w1_ref = next(it) if has_expand else None
    b1_ref = next(it) if has_expand else None
    wd_ref = next(it)
    b2_ref = next(it)
    w3_ref = next(it)
    b3_ref = next(it)
    out_ref = next(it)
    acc_ref = next(it) if n_chunks > 1 else None

    w_out_pad = out_ref.shape[2]
    rows_slc = th_out + 1
    wp2 = x_ref.shape[3]

    p0 = pl.multiple_of(pl.program_id(1) * th_out, th_out)

    # Phase order: (rp, cp) = (0,0) ee, (0,1) eo, (1,0) oe, (1,1) oo; local phase
    # position (i, j) is padded-image position (2i + rp, 2j + cp).
    phase_rc = ((0, 0), (0, 1), (1, 0), (1, 1))
    xs = jnp.concatenate(
        [x_ref[0, p, pl.ds(p0, rows_slc), :, :] for p in range(4)], axis=0)

    if has_expand:
        gates = []
        for rp, cp in phase_rc:
            ii = lax.broadcasted_iota(jnp.int32, (rows_slc, wp2, 1), 0)
            jj = lax.broadcasted_iota(jnp.int32, (rows_slc, wp2, 1), 1)
            prow = 2 * (p0 + ii) + rp
            pcol = 2 * jj + cp
            keep = (prow >= 1) & (prow <= h) & (pcol >= 1) & (pcol <= w)
            gates.append(jnp.where(keep, jnp.float32(0), jnp.float32(_GATE)))
        gate = jnp.concatenate(gates, axis=0)
        y1 = _expand_relu6(xs, w1_ref, b1_ref, gate, dw_dtype)   # one fused matmul
    else:
        y1 = xs.astype(dw_dtype)

    y_ee = y1[0 * rows_slc:1 * rows_slc]
    y_eo = y1[1 * rows_slc:2 * rows_slc]
    y_oe = y1[2 * rows_slc:3 * rows_slc]
    y_oo = y1[3 * rows_slc:4 * rows_slc]

    # Column views: kw=0 -> even col j, kw=1 -> odd col j, kw=2 -> even col j+1
    ee0 = y_ee[:, 0:w_out_pad, :]
    ee2 = y_ee[:, 1:1 + w_out_pad, :]
    eo1 = y_eo[:, 0:w_out_pad, :]
    oe0 = y_oe[:, 0:w_out_pad, :]
    oe2 = y_oe[:, 1:1 + w_out_pad, :]
    oo1 = y_oo[:, 0:w_out_pad, :]

    acc = ee0[0:th_out] * wd_ref[0, 0, :]
    acc = acc + eo1[0:th_out] * wd_ref[0, 1, :]
    acc = acc + ee2[0:th_out] * wd_ref[0, 2, :]
    acc = acc + oe0[0:th_out] * wd_ref[1, 0, :]
    acc = acc + oo1[0:th_out] * wd_ref[1, 1, :]
    acc = acc + oe2[0:th_out] * wd_ref[1, 2, :]
    acc = acc + ee0[1:1 + th_out] * wd_ref[2, 0, :]
    acc = acc + eo1[1:1 + th_out] * wd_ref[2, 1, :]
    acc = acc + ee2[1:1 + th_out] * wd_ref[2, 2, :]
    y2 = jnp.clip(acc.astype(jnp.float32) + b2_ref[...], 0.0, 6.0)

    _project_and_store(y2, w3_ref, b3_ref, None, out_ref, acc_ref,
                       th_out, w_out_pad, n_chunks, False)


# --------------------------------------------------------------------------- #
# Wrapper: PyTorch-shaped parameters; NHWC core + NCHW shim for the spec.
# --------------------------------------------------------------------------- #
def _fold_bn(bn):
    g, b, m, v = bn
    s = g / jnp.sqrt(v + _BN_EPS)
    return s, b - m * s


def inverted_residual_nhwc(x_nhwc, p, *, stride, expand_ratio,
                           row_tile=8, hid_chunk=256, dw_dtype=None):
    assert stride in (1, 2)
    N, H, W, inp = x_nhwc.shape
    hid = p["w_dw"].shape[0]
    oup = p["w_proj"].shape[0]
    has_expand = (expand_ratio != 1)
    identity = (stride == 1 and inp == oup)
    if not has_expand:
        assert hid == inp
    if dw_dtype is None:
        dw_dtype = _default_dw_dtype()

    Ho = (H - 1) // stride + 1
    Wo = (W - 1) // stride + 1
    th_out = max(1, min(row_tile, Ho))
    Ho_pad = _round_up(Ho, th_out)          # ragged last tile -> pad, strip later
    w_out_pad = _round_up(Wo, 8)            # 8-aligned width through DW / project
    oup_pad = _round_up(oup, 128)           # lane-dense output / project N
    if has_expand:
        hid_pad = _round_up(hid, 128)
        chunk = _pick_hid_chunk(hid_pad, hid_chunk)
    else:
        hid_pad, chunk = hid, hid
    n_chunks = hid_pad // chunk

    # Fold eval-mode BN into the conv weights; zero-pad channels (padded hid
    # channels stay 0 through ReLU6 / DW; padded oup columns of w3/b3 are 0).
    s2, b2 = _fold_bn(p["bn2"])
    s3, b3 = _fold_bn(p["bn3"])
    wd = jnp.transpose(p["w_dw"][:, 0, :, :], (1, 2, 0)) * s2[None, None, :]
    wd = jnp.pad(wd, ((0, 0), (0, 0), (0, hid_pad - hid))).astype(dw_dtype)
    b2 = jnp.pad(b2, (0, hid_pad - hid)).reshape(1, hid_pad).astype(jnp.float32)
    w3 = p["w_proj"][:, :, 0, 0].T * s3[None, :]
    w3 = jnp.pad(w3, ((0, hid_pad - hid), (0, oup_pad - oup))).astype(jnp.bfloat16)
    b3 = jnp.pad(b3, (0, oup_pad - oup)).reshape(1, oup_pad).astype(jnp.float32)

    w_args, w_specs = [], []
    if has_expand:
        s1, b1 = _fold_bn(p["bn1"])
        w1 = p["w_exp"][:, :, 0, 0].T * s1[None, :]
        w1 = jnp.pad(w1, ((0, 0), (0, hid_pad - hid))).astype(jnp.bfloat16)
        b1 = jnp.pad(b1, (0, hid_pad - hid)).reshape(1, hid_pad).astype(jnp.float32)
        w_args += [w1, b1]
        w_specs += [pl.BlockSpec((inp, chunk), lambda n, r, c: (0, c)),
                    pl.BlockSpec((1, chunk), lambda n, r, c: (0, c))]
    w_args += [wd, b2, w3, b3]
    w_specs += [pl.BlockSpec((3, 3, chunk), lambda n, r, c: (0, 0, c)),
                pl.BlockSpec((1, chunk), lambda n, r, c: (0, c)),
                pl.BlockSpec((chunk, oup_pad), lambda n, r, c: (c, 0)),
                pl.BlockSpec((1, oup_pad), lambda n, r, c: (0, 0))]

    x32 = x_nhwc.astype(jnp.float32)

    if stride == 1:
        wp = _round_up(w_out_pad + 2, 8)
        hp_rows = Ho_pad + 2
        x_in = jnp.pad(x32, ((0, 0), (1, hp_rows - H - 1), (1, wp - W - 1), (0, 0)))
        x_args = [x_in]
        x_specs = [pl.BlockSpec((1, hp_rows, wp, inp), lambda n, r, c: (n, 0, 0, 0))]
        if identity:
            # Separately-blocked identity operand (width / channel padded) so the
            # residual add needs no sublane-offset slice of the padded image.
            x_id = jnp.pad(x32, ((0, 0), (0, Ho_pad - H), (0, w_out_pad - W),
                                 (0, oup_pad - inp)))
            w_args += [x_id]
            w_specs += [pl.BlockSpec((1, th_out, w_out_pad, oup_pad),
                                     lambda n, r, c: (n, r, 0, 0))]
        kern = functools.partial(_stride1_kernel, th_out=th_out,
                                 has_expand=has_expand, identity=identity,
                                 n_chunks=n_chunks, h=H, w=W, dw_dtype=dw_dtype)
    else:
        rows_ph = Ho_pad + 1
        wp2 = w_out_pad + 8
        x_pad = jnp.pad(x32, ((0, 0), (1, 1), (1, 1), (0, 0)))
        phases = []
        for rp in (0, 1):
            for cp in (0, 1):
                ph = x_pad[:, rp::2, cp::2, :]
                ph = jnp.pad(ph, ((0, 0), (0, rows_ph - ph.shape[1]),
                                  (0, wp2 - ph.shape[2]), (0, 0)))
                phases.append(ph)
        x_in = jnp.stack(phases, axis=1)      # (N, 4, rows_ph, wp2, inp)
        x_args = [x_in]
        x_specs = [pl.BlockSpec((1, 4, rows_ph, wp2, inp),
                                lambda n, r, c: (n, 0, 0, 0, 0))]
        kern = functools.partial(_stride2_kernel, th_out=th_out,
                                 has_expand=has_expand, n_chunks=n_chunks,
                                 h=H, w=W, dw_dtype=dw_dtype)

    scratch = ([pltpu.VMEM((th_out, w_out_pad, oup_pad), jnp.float32)]
               if n_chunks > 1 else [])

    out = pl.pallas_call(
        kern,
        out_shape=jax.ShapeDtypeStruct((N, Ho_pad, w_out_pad, oup_pad), jnp.float32),
        grid=(N, Ho_pad // th_out, n_chunks),
        in_specs=x_specs + w_specs,
        out_specs=pl.BlockSpec((1, th_out, w_out_pad, oup_pad),
                               lambda n, r, c: (n, r, 0, 0)),
        scratch_shapes=scratch,
        compiler_params=pltpu.CompilerParams(
            dimension_semantics=("parallel", "parallel", "arbitrary"),
            vmem_limit_bytes=48 * 1024 * 1024),
    )(*(x_args + w_args))
    return out[:, :Ho, :Wo, :oup]


def inverted_residual(x_nchw, p, *, stride, expand_ratio, **kwargs):
    # TODO(synk): in a full network keep activations NHWC between blocks and call
    # inverted_residual_nhwc directly to avoid these two per-call HBM transposes.
    y = inverted_residual_nhwc(jnp.transpose(x_nchw, (0, 2, 3, 1)), p,
                               stride=stride, expand_ratio=expand_ratio, **kwargs)
    return jnp.transpose(y, (0, 3, 1, 2))


# --------------------------------------------------------------------------- #
# Pure-JAX reference (eval-mode BatchNorm), full f32 precision.
# --------------------------------------------------------------------------- #
def ref_inverted_residual(x, p, *, stride, expand_ratio):
    def bn(y, bn_p):
        g, b, m, v = (t[None, :, None, None] for t in bn_p)
        return (y - m) / jnp.sqrt(v + _BN_EPS) * g + b

    def conv(y, w, s=1, pad=0, groups=1):
        return lax.conv_general_dilated(
            y, w, (s, s), [(pad, pad), (pad, pad)],
            dimension_numbers=("NCHW", "OIHW", "NCHW"),
            feature_group_count=groups, precision=lax.Precision.HIGHEST)

    h = x
    if expand_ratio != 1:
        h = jnp.clip(bn(conv(h, p["w_exp"]), p["bn1"]), 0.0, 6.0)
    h = conv(h, p["w_dw"], s=stride, pad=1, groups=p["w_dw"].shape[0])
    h = jnp.clip(bn(h, p["bn2"]), 0.0, 6.0)
    h = bn(conv(h, p["w_proj"]), p["bn3"])
    if stride == 1 and x.shape[1] == h.shape[1]:
        h = x + h
    return h


def make_params(key, inp, oup, expand_ratio):
    hid = int(round(inp * expand_ratio))
    ks = jax.random.split(key, 6)

    def bn_params(k, c):
        k1, k2, k3, k4 = jax.random.split(k, 4)
        gamma = jax.random.uniform(k1, (c,), jnp.float32, 0.5, 1.5)
        beta = jax.random.normal(k2, (c,), jnp.float32) * 0.1
        mean = jax.random.normal(k3, (c,), jnp.float32) * 0.1
        var = jax.random.uniform(k4, (c,), jnp.float32, 0.5, 1.5)
        return gamma, beta, mean, var

    return {
        "w_exp": jax.random.normal(ks[0], (hid, inp, 1, 1), jnp.float32) * 0.25,
        "bn1": bn_params(ks[1], hid),
        "w_dw": jax.random.normal(ks[2], (hid, 1, 3, 3), jnp.float32) * 0.25,
        "bn2": bn_params(ks[3], hid),
        "w_proj": jax.random.normal(ks[4], (oup, hid, 1, 1), jnp.float32) * 0.25,
        "bn3": bn_params(ks[5], oup),
    }


if __name__ == "__main__":
    key = jax.random.PRNGKey(0)
    # (N, inp, H, W, oup, stride, expand_ratio, row_tile, hid_chunk)
    configs = [
        (2, 4, 16, 16, 4, 1, 4, 8, 256),     # identity + expand (primary)
        (2, 8, 16, 16, 16, 2, 6, 4, 256),    # stride-2 + expand (fused phase matmul)
        (2, 16, 16, 16, 16, 1, 1, 8, 256),   # identity, expand_ratio == 1
        (1, 32, 8, 8, 32, 1, 6, 4, 128),     # identity + expand, 2 hid chunks
    ]
    auto_dw = _default_dw_dtype()

    def tol_for(dw):
        # 3e-2 reflects bf16 MXU inputs (f32 accumulation) vs a full-f32 HIGHEST
        # reference; the bf16 depthwise path (v6e/v7x) adds bf16 accumulation in
        # the 9-tap DW, hence the looser bound there.
        return 3e-2 if dw == jnp.float32 else 6e-2

    for (N, inp, H, W, oup, stride, er, rt, hc) in configs:
        kx, kp, key = jax.random.split(key, 3)
        x = jax.random.normal(kx, (N, inp, H, W), jnp.float32)
        params = make_params(kp, inp, oup, er)
        ref = ref_inverted_residual(x, params, stride=stride, expand_ratio=er)

        out = jax.block_until_ready(
            inverted_residual(x, params, stride=stride, expand_ratio=er,
                              row_tile=rt, hid_chunk=hc))
        assert out.shape == ref.shape, (out.shape, ref.shape)
        t = tol_for(auto_dw)
        np.testing.assert_allclose(np.asarray(out), np.asarray(ref), rtol=t, atol=t)

    # Exercise the other depthwise-dtype path once (works on any chip generation).
    other = jnp.float32 if auto_dw == jnp.bfloat16 else jnp.bfloat16
    N, inp, H, W, oup, stride, er, rt, hc = configs[0]
    kx, kp, key = jax.random.split(key, 3)
    x = jax.random.normal(kx, (N, inp, H, W), jnp.float32)
    params = make_params(kp, inp, oup, er)
    out = jax.block_until_ready(
        inverted_residual(x, params, stride=stride, expand_ratio=er,
                          row_tile=rt, hid_chunk=hc, dw_dtype=other))
    ref = ref_inverted_residual(x, params, stride=stride, expand_ratio=er)
    t = tol_for(other)
    np.testing.assert_allclose(np.asarray(out), np.asarray(ref), rtol=t, atol=t)

    print("KERNEL_OK")
</pallas_src>

<mosaic_0001>
module attributes {stable_mosaic.version = 11 : i64} {
  func.func @_stride1_kernel(%arg0: i32, %arg1: i32, %arg2: i32, %arg3: memref<1x18x24x4xf32, #tpu.memory_space<vmem>>, %arg4: memref<4x128xbf16, #tpu.memory_space<vmem>>, %arg5: memref<1x128xf32, #tpu.memory_space<vmem>>, %arg6: memref<3x3x128xf32, #tpu.memory_space<vmem>>, %arg7: memref<1x128xf32, #tpu.memory_space<vmem>>, %arg8: memref<128x128xbf16, #tpu.memory_space<vmem>>, %arg9: memref<1x128xf32, #tpu.memory_space<vmem>>, %arg10: memref<1x8x16x128xf32, #tpu.memory_space<vmem>>, %arg11: memref<1x8x16x128xf32, #tpu.memory_space<vmem>>) attributes {dimension_semantics = [#tpu.dimension_semantics<parallel>, #tpu.dimension_semantics<parallel>, #tpu.dimension_semantics<arbitrary>], iteration_bounds = array<i64: 2, 2, 1>, scalar_prefetch = 0 : i64, scratch_operands = 0 : i64, tpu.core_type = #tpu.core_type<tc>, window_params = [{transform_indices = @transform_0, window_bounds = array<i64: 1, 18, 24, 4>}, {transform_indices = @transform_1, window_bounds = array<i64: 4, 128>}, {transform_indices = @transform_2, window_bounds = array<i64: 1, 128>}, {transform_indices = @transform_3, window_bounds = array<i64: 3, 3, 128>}, {transform_indices = @transform_4, window_bounds = array<i64: 1, 128>}, {transform_indices = @transform_5, window_bounds = array<i64: 128, 128>}, {pipeline_mode = #tpu.pipeline_mode<synchronous>, transform_indices = @transform_6, window_bounds = array<i64: 1, 128>}, {transform_indices = @transform_7, window_bounds = array<i64: 1, 8, 16, 128>}, {transform_indices = @transform_8, window_bounds = array<i64: 1, 8, 16, 128>}]} {
    %c8_i32 = arith.constant 8 : i32
    %0 = arith.muli %arg1, %c8_i32 : i32
    %1 = tpu.assume_multiple %0, 8 : i32
    %c0 = arith.constant 0 : index
    %2 = arith.index_cast %1 : i32 to index
    %c0_0 = arith.constant 0 : index
    %c0_1 = arith.constant 0 : index
    %3 = vector.load %arg3[%c0, %2, %c0_0, %c0_1] : memref<1x18x24x4xf32, #tpu.memory_space<vmem>>, vector<1x10x24x4xf32>
    %4 = vector.shape_cast %3 : vector<1x10x24x4xf32> to vector<10x24x4xf32>
    %5 = tpu.iota {dimensions = array<i32: 0>} : vector<10x24x1xi32>
    %6 = vector.broadcast %1 : i32 to vector<10x24x1xi32>
    %7 = arith.addi %6, %5 : vector<10x24x1xi32>
    %8 = tpu.iota {dimensions = array<i32: 1>} : vector<10x24x1xi32>
    %c1_i32 = arith.constant 1 : i32
    %9 = vector.broadcast %c1_i32 : i32 to vector<10x24x1xi32>
    %10 = arith.cmpi sge, %7, %9 : vector<10x24x1xi32>
    %c16_i32 = arith.constant 16 : i32
    %11 = vector.broadcast %c16_i32 : i32 to vector<10x24x1xi32>
    %12 = arith.cmpi sle, %7, %11 : vector<10x24x1xi32>
    %13 = arith.andi %10, %12 : vector<10x24x1xi1>
    %c1_i32_2 = arith.constant 1 : i32
    %14 = vector.broadcast %c1_i32_2 : i32 to vector<10x24x1xi32>
    %15 = arith.cmpi sge, %8, %14 : vector<10x24x1xi32>
    %16 = arith.andi %13, %15 : vector<10x24x1xi1>
    %c16_i32_3 = arith.constant 16 : i32
    %17 = vector.broadcast %c16_i32_3 : i32 to vector<10x24x1xi32>
    %18 = arith.cmpi sle, %8, %17 : vector<10x24x1xi32>
    %19 = arith.andi %16, %18 : vector<10x24x1xi1>
    %cst = arith.constant 0.000000e+00 : f32
    %cst_4 = arith.constant -1.000000e+09 : f32
    %20 = vector.broadcast %cst : f32 to vector<10x24x1xf32>
    %21 = vector.broadcast %cst_4 : f32 to vector<10x24x1xf32>
    %22 = arith.select %19, %20, %21 : vector<10x24x1xi1>, vector<10x24x1xf32>
    %23 = vector.shape_cast %4 : vector<10x24x4xf32> to vector<240x4xf32>
    %24 = arith.truncf %23 : vector<240x4xf32> to vector<240x4xbf16>
    %c0_5 = arith.constant 0 : index
    %c0_6 = arith.constant 0 : index
    %25 = vector.load %arg4[%c0_5, %c0_6] : memref<4x128xbf16, #tpu.memory_space<vmem>>, vector<4x128xbf16>
    %cst_7 = arith.constant dense<0.000000e+00> : vector<240x128xf32>
    %26 = tpu.matmul %24, %25, %cst_7 {dimension_numbers = #tpu.dot_dimension_numbers<[1], [0], [0], [1], [0, 0, 1, 1], [], []>} : vector<240x4xbf16>, vector<4x128xbf16>, vector<240x128xf32> -> vector<240x128xf32>
    %27 = vector.shape_cast %26 : vector<240x128xf32> to vector<10x24x128xf32>
    %c0_8 = arith.constant 0 : index
    %c0_9 = arith.constant 0 : index
    %28 = vector.load %arg5[%c0_8, %c0_9] : memref<1x128xf32, #tpu.memory_space<vmem>>, vector<1x128xf32>
    %29 = vector.shape_cast %28 : vector<1x128xf32> to vector<1x1x128xf32>
    %30 = vector.broadcast %29 : vector<1x1x128xf32> to vector<10x24x128xf32>
    %31 = arith.addf %27, %30 : vector<10x24x128xf32>
    %32 = vector.broadcast %22 : vector<10x24x1xf32> to vector<10x24x128xf32>
    %33 = arith.addf %31, %32 : vector<10x24x128xf32>
    %cst_10 = arith.constant 0.000000e+00 : f32
    %cst_11 = arith.constant 6.000000e+00 : f32
    %34 = vector.broadcast %cst_10 : f32 to vector<10x24x128xf32>
    %35 = arith.maximumf %34, %33 : vector<10x24x128xf32>
    %36 = vector.broadcast %cst_11 : f32 to vector<10x24x128xf32>
    %37 = arith.minimumf %36, %35 : vector<10x24x128xf32>
    %38 = vector.extract_strided_slice %37 {offsets = [0, 0, 0], sizes = [10, 16, 128], strides = [1, 1, 1]} : vector<10x24x128xf32> to vector<10x16x128xf32>
    %39 = vector.extract_strided_slice %37 {offsets = [0, 1, 0], sizes = [10, 16, 128], strides = [1, 1, 1]} : vector<10x24x128xf32> to vector<10x16x128xf32>
    %40 = vector.extract_strided_slice %37 {offsets = [0, 2, 0], sizes = [10, 16, 128], strides = [1, 1, 1]} : vector<10x24x128xf32> to vector<10x16x128xf32>
    %41 = vector.extract_strided_slice %38 {offsets = [0, 0, 0], sizes = [8, 16, 128], strides = [1, 1, 1]} : vector<10x16x128xf32> to vector<8x16x128xf32>
    %c0_12 = arith.constant 0 : index
    %c0_13 = arith.constant 0 : index
    %c0_14 = arith.constant 0 : index
    %42 = vector.load %arg6[%c0_12, %c0_13, %c0_14] : memref<3x3x128xf32, #tpu.memory_space<vmem>>, vector<1x1x128xf32>
    %43 = vector.shape_cast %42 : vector<1x1x128xf32> to vector<128xf32>
    %44 = vector.shape_cast %43 : vector<128xf32> to vector<1x1x128xf32>
    %45 = vector.broadcast %44 : vector<1x1x128xf32> to vector<8x16x128xf32>
    %46 = arith.mulf %41, %45 : vector<8x16x128xf32>
    %47 = vector.extract_strided_slice %39 {offsets = [0, 0, 0], sizes = [8, 16, 128], strides = [1, 1, 1]} : vector<10x16x128xf32> to vector<8x16x128xf32>
    %c0_15 = arith.constant 0 : index
    %c1 = arith.constant 1 : index
    %c0_16 = arith.constant 0 : index
    %48 = vector.load %arg6[%c0_15, %c1, %c0_16] : memref<3x3x128xf32, #tpu.memory_space<vmem>>, vector<1x1x128xf32>
    %49 = vector.shape_cast %48 : vector<1x1x128xf32> to vector<128xf32>
    %50 = vector.shape_cast %49 : vector<128xf32> to vector<1x1x128xf32>
    %51 = vector.broadcast %50 : vector<1x1x128xf32> to vector<8x16x128xf32>
    %52 = arith.mulf %47, %51 : vector<8x16x128xf32>
    %53 = arith.addf %46, %52 : vector<8x16x128xf32>
    %54 = vector.extract_strided_slice %40 {offsets = [0, 0, 0], sizes = [8, 16, 128], strides = [1, 1, 1]} : vector<10x16x128xf32> to vector<8x16x128xf32>
    %c0_17 = arith.constant 0 : index
    %c2 = arith.constant 2 : index
    %c0_18 = arith.constant 0 : index
    %55 = vector.load %arg6[%c0_17, %c2, %c0_18] : memref<3x3x128xf32, #tpu.memory_space<vmem>>, vector<1x1x128xf32>
    %56 = vector.shape_cast %55 : vector<1x1x128xf32> to vector<128xf32>
    %57 = vector.shape_cast %56 : vector<128xf32> to vector<1x1x128xf32>
    %58 = vector.broadcast %57 : vector<1x1x128xf32> to vector<8x16x128xf32>
    %59 = arith.mulf %54, %58 : vector<8x16x128xf32>
    %60 = arith.addf %53, %59 : vector<8x16x128xf32>
    %61 = vector.extract_strided_slice %38 {offsets = [1, 0, 0], sizes = [8, 16, 128], strides = [1, 1, 1]} : vector<10x16x128xf32> to vector<8x16x128xf32>
    %c1_19 = arith.constant 1 : index
    %c0_20 = arith.constant 0 : index
    %c0_21 = arith.constant 0 : index
    %62 = vector.load %arg6[%c1_19, %c0_20, %c0_21] : memref<3x3x128xf32, #tpu.memory_space<vmem>>, vector<1x1x128xf32>
    %63 = vector.shape_cast %62 : vector<1x1x128xf32> to vector<128xf32>
    %64 = vector.shape_cast %63 : vector<128xf32> to vector<1x1x128xf32>
    %65 = vector.broadcast %64 : vector<1x1x128xf32> to vector<8x16x128xf32>
    %66 = arith.mulf %61, %65 : vector<8x16x128xf32>
    %67 = arith.addf %60, %66 : vector<8x16x128xf32>
    %68 = vector.extract_strided_slice %39 {offsets = [1, 0, 0], sizes = [8, 16, 128], strides = [1, 1, 1]} : vector<10x16x128xf32> to vector<8x16x128xf32>
    %c1_22 = arith.constant 1 : index
    %c1_23 = arith.constant 1 : index
    %c0_24 = arith.constant 0 : index
    %69 = vector.load %arg6[%c1_22, %c1_23, %c0_24] : memref<3x3x128xf32, #tpu.memory_space<vmem>>, vector<1x1x128xf32>
    %70 = vector.shape_cast %69 : vector<1x1x128xf32> to vector<128xf32>
    %71 = vector.shape_cast %70 : vector<128xf32> to vector<1x1x128xf32>
    %72 = vector.broadcast %71 : vector<1x1x128xf32> to vector<8x16x128xf32>
    %73 = arith.mulf %68, %72 : vector<8x16x128xf32>
    %74 = arith.addf %67, %73 : vector<8x16x128xf32>
    %75 = vector.extract_strided_slice %40 {offsets = [1, 0, 0], sizes = [8, 16, 128], strides = [1, 1, 1]} : vector<10x16x128xf32> to vector<8x16x128xf32>
    %c1_25 = arith.constant 1 : index
    %c2_26 = arith.constant 2 : index
    %c0_27 = arith.constant 0 : index
    %76 = vector.load %arg6[%c1_25, %c2_26, %c0_27] : memref<3x3x128xf32, #tpu.memory_space<vmem>>, vector<1x1x128xf32>
    %77 = vector.shape_cast %76 : vector<1x1x128xf32> to vector<128xf32>
    %78 = vector.shape_cast %77 : vector<128xf32> to vector<1x1x128xf32>
    %79 = vector.broadcast %78 : vector<1x1x128xf32> to vector<8x16x128xf32>
    %80 = arith.mulf %75, %79 : vector<8x16x128xf32>
    %81 = arith.addf %74, %80 : vector<8x16x128xf32>
    %82 = vector.extract_strided_slice %38 {offsets = [2, 0, 0], sizes = [8, 16, 128], strides = [1, 1, 1]} : vector<10x16x128xf32> to vector<8x16x128xf32>
    %c2_28 = arith.constant 2 : index
    %c0_29 = arith.constant 0 : index
    %c0_30 = arith.constant 0 : index
    %83 = vector.load %arg6[%c2_28, %c0_29, %c0_30] : memref<3x3x128xf32, #tpu.memory_space<vmem>>, vector<1x1x128xf32>
    %84 = vector.shape_cast %83 : vector<1x1x128xf32> to vector<128xf32>
    %85 = vector.shape_cast %84 : vector<128xf32> to vector<1x1x128xf32>
    %86 = vector.broadcast %85 : vector<1x1x128xf32> to vector<8x16x128xf32>
    %87 = arith.mulf %82, %86 : vector<8x16x128xf32>
    %88 = arith.addf %81, %87 : vector<8x16x128xf32>
    %89 = vector.extract_strided_slice %39 {offsets = [2, 0, 0], sizes = [8, 16, 128], strides = [1, 1, 1]} : vector<10x16x128xf32> to vector<8x16x128xf32>
    %c2_31 = arith.constant 2 : index
    %c1_32 = arith.constant 1 : index
    %c0_33 = arith.constant 0 : index
    %90 = vector.load %arg6[%c2_31, %c1_32, %c0_33] : memref<3x3x128xf32, #tpu.memory_space<vmem>>, vector<1x1x128xf32>
    %91 = vector.shape_cast %90 : vector<1x1x128xf32> to vector<128xf32>
    %92 = vector.shape_cast %91 : vector<128xf32> to vector<1x1x128xf32>
    %93 = vector.broadcast %92 : vector<1x1x128xf32> to vector<8x16x128xf32>
    %94 = arith.mulf %89, %93 : vector<8x16x128xf32>
    %95 = arith.addf %88, %94 : vector<8x16x128xf32>
    %96 = vector.extract_strided_slice %40 {offsets = [2, 0, 0], sizes = [8, 16, 128], strides = [1, 1, 1]} : vector<10x16x128xf32> to vector<8x16x128xf32>
    %c2_34 = arith.constant 2 : index
    %c2_35 = arith.constant 2 : index
    %c0_36 = arith.constant 0 : index
    %97 = vector.load %arg6[%c2_34, %c2_35, %c0_36] : memref<3x3x128xf32, #tpu.memory_space<vmem>>, vector<1x1x128xf32>
    %98 = vector.shape_cast %97 : vector<1x1x128xf32> to vector<128xf32>
    %99 = vector.shape_cast %98 : vector<128xf32> to vector<1x1x128xf32>
    %100 = vector.broadcast %99 : vector<1x1x128xf32> to vector<8x16x128xf32>
    %101 = arith.mulf %96, %100 : vector<8x16x128xf32>
    %102 = arith.addf %95, %101 : vector<8x16x128xf32>
    %c0_37 = arith.constant 0 : index
    %c0_38 = arith.constant 0 : index
    %103 = vector.load %arg7[%c0_37, %c0_38] : memref<1x128xf32, #tpu.memory_space<vmem>>, vector<1x128xf32>
    %104 = vector.shape_cast %103 : vector<1x128xf32> to vector<1x1x128xf32>
    %105 = vector.broadcast %104 : vector<1x1x128xf32> to vector<8x16x128xf32>
    %106 = arith.addf %102, %105 : vector<8x16x128xf32>
    %cst_39 = arith.constant 0.000000e+00 : f32
    %cst_40 = arith.constant 6.000000e+00 : f32
    %107 = vector.broadcast %cst_39 : f32 to vector<8x16x128xf32>
    %108 = arith.maximumf %107, %106 : vector<8x16x128xf32>
    %109 = vector.broadcast %cst_40 : f32 to vector<8x16x128xf32>
    %110 = arith.minimumf %109, %108 : vector<8x16x128xf32>
    %111 = vector.shape_cast %110 : vector<8x16x128xf32> to vector<128x128xf32>
    %112 = arith.truncf %111 : vector<128x128xf32> to vector<128x128xbf16>
    %c0_41 = arith.constant 0 : index
    %c0_42 = arith.constant 0 : index
    %113 = vector.load %arg8[%c0_41, %c0_42] : memref<128x128xbf16, #tpu.memory_space<vmem>>, vector<128x128xbf16>
    %cst_43 = arith.constant dense<0.000000e+00> : vector<128x128xf32>
    %114 = tpu.matmul %112, %113, %cst_43 {dimension_numbers = #tpu.dot_dimension_numbers<[1], [0], [0], [1], [0, 0, 1, 1], [], []>} : vector<128x128xbf16>, vector<128x128xbf16>, vector<128x128xf32> -> vector<128x128xf32>
    %115 = vector.shape_cast %114 : vector<128x128xf32> to vector<8x16x128xf32>
    %c0_44 = arith.constant 0 : index
    %c0_45 = arith.constant 0 : index
    %116 = vector.load %arg9[%c0_44, %c0_45] : memref<1x128xf32, #tpu.memory_space<vmem>>, vector<1x128xf32>
    %117 = vector.shape_cast %116 : vector<1x128xf32> to vector<1x1x128xf32>
    %118 = vector.broadcast %117 : vector<1x1x128xf32> to vector<8x16x128xf32>
    %119 = arith.addf %115, %118 : vector<8x16x128xf32>
    %c0_46 = arith.constant 0 : index
    %c0_47 = arith.constant 0 : index
    %c0_48 = arith.constant 0 : index
    %c0_49 = arith.constant 0 : index
    %120 = vector.load %arg10[%c0_46, %c0_47, %c0_48, %c0_49] : memref<1x8x16x128xf32, #tpu.memory_space<vmem>>, vector<1x8x16x128xf32>
    %121 = vector.shape_cast %120 : vector<1x8x16x128xf32> to vector<8x16x128xf32>
    %122 = arith.addf %119, %121 : vector<8x16x128xf32>
    %c0_50 = arith.constant 0 : index
    %c0_51 = arith.constant 0 : index
    %c0_52 = arith.constant 0 : index
    %c0_53 = arith.constant 0 : index
    %123 = vector.load %arg11[%c0_50, %c0_51, %c0_52, %c0_53] : memref<1x8x16x128xf32, #tpu.memory_space<vmem>>, vector<1x8x16x128xf32>
    %124 = vector.shape_cast %123 : vector<1x8x16x128xf32> to vector<8x16x128xf32>
    %125 = vector.shape_cast %122 : vector<8x16x128xf32> to vector<1x8x16x128xf32>
    tpu.vector_store %arg11[%c0_50, %c0_51, %c0_52, %c0_53], %125 {strides = array<i32>} : memref<1x8x16x128xf32, #tpu.memory_space<vmem>>, vector<1x8x16x128xf32>,
    return
  }
  func.func @transform_0(%arg0: i32, %arg1: i32, %arg2: i32) -> (i32, i32, i32, i32) {
    %c0_i32 = arith.constant 0 : i32
    %c0_i32_0 = arith.constant 0 : i32
    %c0_i32_1 = arith.constant 0 : i32
    %c0_i32_2 = arith.constant 0 : i32
    return %arg0, %c0_i32, %c0_i32_0, %c0_i32_1 : i32, i32, i32, i32
  }
  func.func @transform_1(%arg0: i32, %arg1: i32, %arg2: i32) -> (i32, i32) {
    %c0_i32 = arith.constant 0 : i32
    %c0_i32_0 = arith.constant 0 : i32
    return %c0_i32, %arg2 : i32, i32
  }
  func.func @transform_2(%arg0: i32, %arg1: i32, %arg2: i32) -> (i32, i32) {
    %c0_i32 = arith.constant 0 : i32
    %c0_i32_0 = arith.constant 0 : i32
    return %c0_i32, %arg2 : i32, i32
  }
  func.func @transform_3(%arg0: i32, %arg1: i32, %arg2: i32) -> (i32, i32, i32) {
    %c0_i32 = arith.constant 0 : i32
    %c0_i32_0 = arith.constant 0 : i32
    %c0_i32_1 = arith.constant 0 : i32
    return %c0_i32, %c0_i32_0, %arg2 : i32, i32, i32
  }
  func.func @transform_4(%arg0: i32, %arg1: i32, %arg2: i32) -> (i32, i32) {
    %c0_i32 = arith.constant 0 : i32
    %c0_i32_0 = arith.constant 0 : i32
    return %c0_i32, %arg2 : i32, i32
  }
  func.func @transform_5(%arg0: i32, %arg1: i32, %arg2: i32) -> (i32, i32) {
    %c0_i32 = arith.constant 0 : i32
    %c0_i32_0 = arith.constant 0 : i32
    return %arg2, %c0_i32 : i32, i32
  }
  func.func @transform_6(%arg0: i32, %arg1: i32, %arg2: i32) -> (i32, i32) {
    %c0_i32 = arith.constant 0 : i32
    %c0_i32_0 = arith.constant 0 : i32
    %c0_i32_1 = arith.constant 0 : i32
    return %c0_i32, %c0_i32_0 : i32, i32
  }
  func.func @transform_7(%arg0: i32, %arg1: i32, %arg2: i32) -> (i32, i32, i32, i32) {
    %c0_i32 = arith.constant 0 : i32
    %c0_i32_0 = arith.constant 0 : i32
    %c0_i32_1 = arith.constant 0 : i32
    return %arg0, %arg1, %c0_i32, %c0_i32_0 : i32, i32, i32, i32
  }
  func.func @transform_8(%arg0: i32, %arg1: i32, %arg2: i32) -> (i32, i32, i32, i32) {
    %c0_i32 = arith.constant 0 : i32
    %c0_i32_0 = arith.constant 0 : i32
    %c0_i32_1 = arith.constant 0 : i32
    return %arg0, %arg1, %c0_i32, %c0_i32_0 : i32, i32, i32, i32
  }
}

</mosaic_0001>

<bundles_post_ra>
// kernel: tpu_custom_call.1
= control target key start
LH: loop header
LB: loop body
LE: loop exit
PB: predicated region body
PF: predicated region fallthrough
CT: control target
= control target key end

     0   :  { %s4267_s0 = inlined_call_operand.vmem [shape: f32[2,18,24,4], index: 0, kind: input, shape index: {}]   ;;  %s4268_s1 = inlined_call_operand.vmem [shape: bf16[4,128], index: 1, kind: input, shape index: {}]   ;;  %s4269_s2 = inlined_call_operand.vmem [shape: f32[1,128], index: 2, kind: input, shape index: {}]   ;;  %s4270_s3 = inlined_call_operand.vmem [shape: f32[3,3,128], index: 3, kind: input, shape index: {}]   ;;  %s4271_s4 = inlined_call_operand.vmem [shape: f32[1,128], index: 4, kind: input, shape index: {}]   ;;  %s4272_s5 = inlined_call_operand.vmem [shape: bf16[128,128], index: 5, kind: input, shape index: {}]   ;;  %s4273_s6 = inlined_call_operand.vmem [shape: f32[1,128], index: 6, kind: input, shape index: {}]   ;;  %s4274_s7 = inlined_call_operand.vmem [shape: f32[2,16,16,128], index: 7, kind: input, shape index: {}]   ;;  %s4275_s8 = inlined_call_operand.hbm [shape: f32[2,16,16,128], index: 8, kind: output, shape index: {}]  }
   0x1   :  { %4305 = sst [smem:[#allocation25_spill]] %s4267_s0 }
   0x2   :  { %4306 = sst [smem:[#allocation26_spill]] %s4268_s1 }
   0x3   :  { %4307 = sst [smem:[#allocation27_spill]] %s4269_s2 }
   0x4   :  { %13 = vsyncpa [#allocation3], 0 }
   0x5   :  { %15 = vsyncpa [#allocation3 + $0x1], 0  ;;  %s2738_s27 = smov 0   ;;  %s2740_s28 = smov 0  }
   0x6   :  { %s2742_s29 = smov 0   ;;  %s2744_s30 = smov 0  }
   0x7   :  { %s2746_s9 = smov 0   ;;  %s2748_s10 = smov 0  }
   0x8   :  { %s2750_s11 = smov 0   ;;  %s2752_s12 = smov 0  }
   0x9 LB: > { %s2301_s13 = sadd.s32 4294967295, %s2685_s12   ;;  %s2302_s14 = sadd.s32 4294967294, %s2685_s12   ;;  %s2685_s12 = sphi %s2752_s12, %s21_s12   ;;  %s2681_s11 = sphi %s2750_s11, %s4470_s11   ;;  %s2677_s10 = sphi %s2748_s10, %s4469_s10   ;;  %s2673_s9 = sphi %s2746_s9, %s4468_s9   ;;  %s2669_s30 = sphi %s2744_s30, %s4467_s30   ;;  %s2665_s29 = sphi %s2742_s29, %s4466_s29   ;;  %s2661_s28 = sphi %s2740_s28, %s4465_s28   ;;  %s2657_s27 = sphi %s2738_s27, %s4464_s27  }
   0xa   : > { %s36_s15 = sadd.s32 1, %s2677_s10  ;;  %s40_s16 = sadd.s32 1, %s2681_s11 }
   0xb   : > { %p38_p0 = scmp.ge.s32.totalorder %s36_s15, 2  ;;  %p264_p1 = scmp.ne.s32.totalorder %s2665_s29, %s2661_s28 }
   0xc   : > { %p265_p2 = scmp.eq.s32.totalorder %s2301_s13, 3  ;;  %p270_p5 = scmp.ne.s32.totalorder %s2661_s28, %s2657_s27 }
   0xd   : > { %s4472_s15 = smov (%p38_p0, %s36_s15), 0  ;;  %s4474_s16 = smov (!%p38_p0, %s40_s16), %s2681_s11 }
   0xe   : > { %s250_s17 = ssub.s32 %s2677_s10, %s4472_s15  ;;  %p2789_p3 = por %p265_p2, %p264_p1 }
   0xf   : > { %p42_p4 = scmp.ge.s32.totalorder %s4474_s16, 2  ;;  %p271_p6 = scmp.eq.s32.totalorder %s2302_s14, 3 }
  0x10   : > { %p2310_p7 = scmp.ge.s32.totalorder %s2685_s12, 1  ;;  %p349_p9 = scmp.lt.s32.totalorder %s2685_s12, 5 }
  0x11   : > { %s4476_s16 = smov (%p42_p4, %s4474_s16), 0  ;;  %p2798_p8 = por %p271_p6, %p270_p5 }
  0x12   : > { %s249_s20 = ssub.s32 %s2681_s11, %s4476_s16  ;;  %s254_s21 = sadd.s32 1, %s2665_s29 }
  0x13   : > { %s251_s22 = sor.u32 %s250_s17, %s249_s20  ;;  %p350_p10 = pnand %p2310_p7, %p349_p9 }
  0x14   : > { %p252_p11 = scmp.eq.s32.totalorder %s251_s22, 0 }
  0x15   : > { %353 = sbr.rel (%p350_p10) target bundleno = 687 (0x2af), region = 52 }
  0x16   : > { %s2807_s23 = scalar_select %p252_p11, %s2665_s29, %s254_s21  }
  0x1c   : > { %s4310_s1 = sld [smem:[#allocation26_spill]]  ;;  %vm685_vm0 = vcmask 1041408   ;;  %p412_p12 = scmp.lt.s32.totalorder %s2673_s9, 1  ;;  %v2687_v1 = vmov 0.0   ;;  %vm2688_vm1 = vmmov 0   ;;  %vm639_vm2 = vcmask 31744  }
  0x1d   : > { %2400 = vmatprep.subr.bf16.mxu0 %v2687_v1  ;;  %2402 = vmatprep.mubr.msk.bf16.mxu0 %vm2688_vm1, %v2687_v1  ;;  %s2318_s13 = smul.u32 192, %s2669_s30  ;;  %s4311_s0 = sld [smem:[#allocation25_spill]]  ;;  %v2573_v48 = vld [vmem:[%s4272_s5] sm:$0xff]   ;;  %v2574_v49 = vld [vmem:[%s4272_s5 + $0x8] sm:$0xff]   ;;  %v2575_v50 = vld [vmem:[%s4272_s5 + $0x10] sm:$0xff]   ;;  %v493_v56 = vlaneseq }
  0x1e   : > { %s2817_s26 = scalar_select %p412_p12, %s2673_s9, 1  ;;  %2494 = vmatprep.subr.bf16.mxu1 %v2687_v1  ;;  %2442 = vmatprep.mubr.msk.bf16.mxu1 %vm2688_vm1, %v2687_v1  ;;  %v2576_v51 = vld [vmem:[%s4272_s5 + $0x18] sm:$0xff]   ;;  %v2577_v52 = vld [vmem:[%s4272_s5 + $0x20] sm:$0xff]   ;;  %v2578_v53 = vld [vmem:[%s4272_s5 + $0x28] sm:$0xff]  }
  0x1f   : > { %v2579_v54 = vld [vmem:[%s4272_s5 + $0x30] sm:$0xff]   ;;  %v2580_v55 = vld [vmem:[%s4272_s5 + $0x38] sm:$0xff]   ;;  %s2925_s24 = sshll.u32 %s2669_s30, 3  ;;  %v2928_v59 = vshrl.u32 %v493_v56, 7  ;;  %s4357_s2 = sld [smem:[#allocation27_spill]] }
  0x20   : > { %s2496_s14 = smul.u32 432, %s2817_s26  ;;  %v483_v57 = vstv %s2925_s24  ;;  %p440_p13 = scmp.lt.s32.totalorder %s2925_s24, 15 }
  0x21   : > { %v484_v58 = vadd.s32 1, %v483_v57  ;;  %v485_v60 = vadd.s32 2, %v483_v57  ;;  %v486_v61 = vadd.s32 3, %v483_v57  ;;  %vm497_vm3 = vcmp.ge.s32.totalorder %v483_v57, 1  ;;  %s409_s20 = sand.u32 1, %s2661_s28  }
  0x22   : > { %v638_v0 = vld [vmem:[%s4310_s1] sm:$0x3]  ;;  %vm507_vm4 = vcmp.le.s32.totalorder %v483_v57, 16  ;;  %v2931_v62 = vadd.s32 16, %v2928_v59  ;;  %v487_v63 = vadd.s32 4, %v483_v57  ;;  %vm4279_vm10 = vcmp.ge.s32.totalorder %v2928_v59, 1 }
  0x23   : > { %v687_v2 = vsel %vm685_vm0, %v638_v0, 0  ;;  %s416_s21 = scalar_lea.vmem %s4311_s0, %s2496_s14  ;;  %vm498_vm5 = vcmp.ge.s32.totalorder %v484_v58, 1  ;;  %vm508_vm6 = vcmp.le.s32.totalorder %v484_v58, 16  ;;  %v490_v0 = vadd.s32 7, %v483_v57  ;;  %vm2933_vm9 = vmand %vm497_vm3, %vm507_vm4  ;;  %s4478_s24 = smov (!%p440_p13, %s2925_s24), 15 }
  0x24   : > { %2401 = vmatpush3.bf16.msra.mxu0 %v687_v2  ;;  %2495 = vmatpush3.bf16.msra.mxu1 %v687_v2  ;;  %s2827_s22 = scalar_lea.vmem %s416_s21, %s2318_s13  ;;  %vm499_vm7 = vcmp.ge.s32.totalorder %v485_v60, 1  ;;  %vm509_vm8 = vcmp.le.s32.totalorder %v485_v60, 16  ;;  %vm500_vm11 = vcmp.ge.s32.totalorder %v486_v61, 1  ;;  %vm510_vm12 = vcmp.le.s32.totalorder %v486_v61, 16  ;;  %vm2939_vm14 = vmand %vm498_vm5, %vm508_vm6  ;;  %v3311_v60 = vld [vmem:[%s4270_s3 + $0x5] ss:$0 sm:$0xff] }
  0x25   : > { %v453_v3 = vld [vmem:[%s2827_s22] sm:$0xff]  ;;  %v454_v4 = vld [vmem:[%s2827_s22 + $0x8] sm:$0xff]  ;;  %v455_v8 = vld [vmem:[%s2827_s22 + $0x10] sm:$0xff]  ;;  %2462 = vmatprep.subr.bf16.mxu1 %v2573_v48  ;;  %vm4277_vm13 = vcmp.le.s32.totalorder %v2931_v62, 16  ;;  %v4314_v2 = vmov 0  ;;  %vm501_vm15 = vcmp.ge.s32.totalorder %v487_v63, 1 }
  0x26   : > { %v623_v5 = vpack.c.bf16 %v454_v4, %v453_v3  ;;  %v473_v6 = vld [vmem:[%s2827_s22 + $0xa0] sm:$0xff]  ;;  %v474_v7 = vld [vmem:[%s2827_s22 + $0xa8] sm:$0xff]  ;;  %v456_v9 = vld [vmem:[%s2827_s22 + $0x18] sm:$0xff]  ;;  %v4315_v2 = vsel %vm2939_vm14, 4294967295, %v4314_v2  ;;  %vm511_vm0 = vcmp.le.s32.totalorder %v487_v63, 16  ;;  %v4316_v3 = vmov 0 }
  0x27   : > { %v633_v10 = vpack.c.bf16 %v474_v7, %v473_v6  ;;  %v624_v11 = vpack.c.bf16 %v456_v9, %v455_v8  ;;  %v475_v12 = vld [vmem:[%s2827_s22 + $0xb0] sm:$0xff]  ;;  %v476_v13 = vld [vmem:[%s2827_s22 + $0xb8] sm:$0xff]  ;;  %v457_v15 = vld [vmem:[%s2827_s22 + $0x20] sm:$0xff]  ;;  %v489_v4 = vadd.s32 6, %v483_v57  ;;  %vm514_vm3 = vcmp.le.s32.totalorder %v490_v0, 16  ;;  %s2314_s25 = sshll.u32 %s4478_s24, 1 }
  0x28   : > { %2403 = vmatmul.mubr.msk.bf16.vlgmr.msra.gmra.mrb[0].mxu0 %vm639_vm2, %v623_v5  ;;  %v634_v14 = vpack.c.bf16 %v476_v13, %v475_v12  ;;  %v458_v16 = vld [vmem:[%s2827_s22 + $0x28] sm:$0xff]  ;;  %v477_v18 = vld [vmem:[%s2827_s22 + $0xc0] sm:$0xff]  ;;  %v459_v21 = vld [vmem:[%s2827_s22 + $0x30] sm:$0xff]  ;;  %v4320_v6 = vmov 0  ;;  %v4324_v8 = vmov 0  ;;  %v4330_v12 = vmov 0 }
  0x29   : > { %2406 = vmatprep.mubr.msk.bf16.mxu0 %vm2688_vm1, %v2687_v1  ;;  %2443 = vmatmul.mubr.msk.bf16.vlgmr.msra.gmra.mrb[0].mxu1 %vm639_vm2, %v633_v10  ;;  %v625_v17 = vpack.c.bf16 %v458_v16, %v457_v15  ;;  %v478_v19 = vld [vmem:[%s2827_s22 + $0xc8] sm:$0xff]  ;;  %v460_v22 = vld [vmem:[%s2827_s22 + $0x38] sm:$0xff]  ;;  %v479_v24 = vld [vmem:[%s2827_s22 + $0xd0] sm:$0xff]  ;;  %v491_v10 = vadd.s32 8, %v483_v57  ;;  %v4332_v13 = vmov 0  ;;  %v4336_v15 = vmov 0 }
  0x2a   : > { %2446 = vmatprep.mubr.msk.bf16.mxu1 %vm2688_vm1, %v2687_v1  ;;  %v635_v20 = vpack.c.bf16 %v478_v19, %v477_v18  ;;  %v626_v23 = vpack.c.bf16 %v460_v22, %v459_v21  ;;  %v480_v25 = vld [vmem:[%s2827_s22 + $0xd8] sm:$0xff]  ;;  %v461_v27 = vld [vmem:[%s2827_s22 + $0x40] sm:$0xff]  ;;  %v462_v28 = vld [vmem:[%s2827_s22 + $0x48] sm:$0xff]  ;;  %2463 = vmatpush3.bf16.msra.mxu1 %v2573_v48  ;;  %v4338_v16 = vmov 0  ;;  %v4342_v18 = vmov 0  ;;  %s2315_s13 = sshll.u32 %s2817_s26, 5 }
  0x2b   : > { %v636_v26 = vpack.c.bf16 %v480_v25, %v479_v24  ;;  %v627_v29 = vpack.c.bf16 %v462_v28, %v461_v27  ;;  %v481_v30 = vld [vmem:[%s2827_s22 + $0xe0] sm:$0xff]  ;;  %v482_v31 = vld [vmem:[%s2827_s22 + $0xe8] sm:$0xff]  ;;  %v463_v33 = vld [vmem:[%s2827_s22 + $0x50] sm:$0xff]  ;;  %2464 = vmatprep.subr.bf16.mxu1 %v2574_v49  ;;  %v488_v19 = vadd.s32 5, %v483_v57  ;;  %v492_v21 = vadd.s32 9, %v483_v57  ;;  %s444_s14 = sadd.s32 %s2315_s13, %s2314_s25  ;;  %s2311_s24 = sshll.u32 %s409_s20, 7 }
  0x2c   : > { %v637_v32 = vpack.c.bf16 %v482_v31, %v481_v30  ;;  %v464_v34 = vld [vmem:[%s2827_s22 + $0x58] sm:$0xff]  ;;  %v465_v36 = vld [vmem:[%s2827_s22 + $0x60] sm:$0xff]  ;;  %v466_v37 = vld [vmem:[%s2827_s22 + $0x68] sm:$0xff]  ;;  %s2316_s17 = sshll.u32 %s444_s14, 3  ;;  %s4161_s1 = scalar_lea.vmem [#allocation2], %s2311_s24 }
  0x2d   : > { %v628_v35 = vpack.c.bf16 %v464_v34, %v463_v33  ;;  %v629_v38 = vpack.c.bf16 %v466_v37, %v465_v36  ;;  %v467_v39 = vld [vmem:[%s2827_s22 + $0x70] sm:$0xff]  ;;  %v468_v40 = vld [vmem:[%s2827_s22 + $0x78] sm:$0xff]  ;;  %v469_v42 = vld [vmem:[%s2827_s22 + $0x80] sm:$0xff]  ;;  %s4144_s0 = scalar_lea.vmem %s4274_s7, %s2316_s17  ;;  %s2363_s26 = sshll.u32 %s2673_s9, 5 }
  0x2e   : > { %v630_v41 = vpack.c.bf16 %v468_v40, %v467_v39  ;;  %v470_v43 = vld [vmem:[%s2827_s22 + $0x88] sm:$0xff]  ;;  %v471_v45 = vld [vmem:[%s2827_s22 + $0x90] sm:$0xff]  ;;  %v472_v46 = vld [vmem:[%s2827_s22 + $0x98] sm:$0xff]  ;;  %2465 = vmatpush3.bf16.msra.mxu1 %v2574_v49  ;;  %s2690_s22 = smov [#allocation2]  }
  0x2f   : > { %v631_v44 = vpack.c.bf16 %v470_v43, %v469_v42  ;;  %v632_v47 = vpack.c.bf16 %v472_v46, %v471_v45  ;;  %2466 = vmatprep.subr.bf16.mxu1 %v2575_v50  ;;  %vm2951_vm4 = vmand %vm2933_vm9, %vm4279_vm10  ;;  %v3077_v28 = vld [vmem:[%s4357_s2] ss:$0 sm:$0xff]  ;;  %v3229_v5 = vld [vmem:[%s4270_s3 + $0x1] ss:$0 sm:$0xff]  ;;  %s2367_s2 = sshll.u32 %s2669_s30, 4  ;;  %s2130_s30 = sshll.u32 %s4161_s1, 4  ;;  %s4208_s30 = int_to_ptr.vmem [resolvable:$true] %s2130_s30 }
  0x30   : > { %2407 = vmatmul.mubr.msk.bf16.gmra.mrb[4].mxu0 %vm639_vm2, %v624_v11  ;;  %vm2955_vm5 = vmand %vm500_vm11, %vm510_vm12  ;;  %v4328_v11 = vmov 0  ;;  %s2127_s25 = sadd.s32 %s2367_s2, %s2363_s26  ;;  %s2591_s21 = scalar_lea.vmem %s4208_s30, 2048 }
  0x31   : > { %2410 = vmatprep.mubr.msk.bf16.mxu0 %vm2688_vm1, %v2687_v1  ;;  %2447 = vmatmul.mubr.msk.bf16.gmra.mrb[4].mxu1 %vm639_vm2, %v634_v14  ;;  %v4321_v6 = vsel %vm2955_vm5, 4294967295, %v4320_v6  ;;  %vm2963_vm6 = vmand %vm2933_vm9, %vm4277_vm13  ;;  %s2364_s13 = sshll.u32 %s2127_s25, 7  ;;  %p2592_p0 = scmp.ne.s32.totalorder %s4208_s30, %s2591_s21 }
  0x32   : > { %2450 = vmatprep.mubr.msk.bf16.mxu1 %vm2688_vm1, %v2687_v1  ;;  %2467 = vmatpush3.bf16.msra.mxu1 %v2575_v50  ;;  %vm2983_vm11 = vmand %vm2939_vm14, %vm4277_vm13  ;;  %s4206_s17 = scalar_lea.hbm %s4275_s8, %s2364_s13  ;;  %s2595_s24 = sshll.u32 %s2690_s22, 4  ;;  %s2596_s24 = int_to_ptr.vmem [resolvable:$false] %s2595_s24 }
  0x33   : > { %2468 = vmatprep.subr.bf16.mxu1 %v2576_v51  ;;  %v4329_v11 = vsel %vm2983_vm11, 4294967295, %v4328_v11  ;;  %vm3011_vm11 = vmand %vm2955_vm5, %vm4279_vm10  ;;  %p2593_p1 = pnand %p2592_p0, %p2789_p3  ;;  %s2597_s2 = scalar_lea.vmem %s2596_s24, 4096 }
  0x34   : > { %v4337_v15 = vsel %vm3011_vm11, 4294967295, %v4336_v15  ;;  %p2598_p4 = scmp.lt.s32.totalorder %s4208_s30, %s2596_s24  ;;  %p2599_p5 = scmp.lt.s32.totalorder %s2597_s2, %s2591_s21 }
  0x35   : > { %p2594_p2 = pneg %p2593_p1 }
  0x36   : > { %2469 = vmatpush3.bf16.msra.mxu1 %v2576_v51  ;;  %p2600_p6 = por %p2599_p5, %p2598_p4 }
  0x37   : > { %2470 = vmatprep.subr.bf16.mxu1 %v2577_v52 }
  0x38   : > { %2411 = vmatmul.mubr.msk.bf16.gmra.mrb[8].mxu0 %vm639_vm2, %v625_v17  ;;  %v4340_v17 = vmov 0  ;;  %p2601_p7 = pnand %p2600_p6, %p2594_p2 }
  0x39   : > { %2414 = vmatprep.mubr.msk.bf16.mxu0 %vm2688_vm1, %v2687_v1  ;;  %2451 = vmatmul.mubr.msk.bf16.gmra.mrb[8].mxu1 %vm639_vm2, %v635_v20 }
  0x3a   : > { %2454 = vmatprep.mubr.msk.bf16.mxu1 %vm2688_vm1, %v2687_v1  ;;  %2471 = vmatpush3.bf16.msra.mxu1 %v2577_v52 }
  0x3b   : > { %2472 = vmatprep.subr.bf16.mxu1 %v2578_v53 }
  0x3e   : > { %2473 = vmatpush3.bf16.msra.mxu1 %v2578_v53 }
  0x3f   : > { %2474 = vmatprep.subr.bf16.mxu1 %v2579_v54 }
  0x40   : > { %2415 = vmatmul.mubr.msk.bf16.gmra.mrb[12].mxu0 %vm639_vm2, %v626_v23 }
  0x41   : > { %2418 = vmatprep.mubr.msk.bf16.mxu0 %vm2688_vm1, %v2687_v1  ;;  %2455 = vmatmul.mubr.msk.bf16.gmra.mrb[12].mxu1 %vm639_vm2, %v636_v26  ;;  %v2689_v26 = vmov -1e+09  }
  0x42   : > { %2458 = vmatprep.mubr.msk.bf16.mxu1 %vm2688_vm1, %v2687_v1  ;;  %2475 = vmatpush3.bf16.msra.mxu1 %v2579_v54  ;;  %v593_v27 = vsel %vm2951_vm4, 0.0, %v2689_v26  ;;  %v594_v30 = vsel %vm2933_vm9, 0.0, %v2689_v26  ;;  %v3093_v31 = vsel %vm2963_vm6, 0.0, %v2689_v26  ;;  %vm4365_vm9 = vnez %v4329_v11  ;;  %v3252_v11 = vld [vmem:[%s4270_s3 + $0x2] ss:$0 sm:$0xff] }
  0x43   : > { %2476 = vmatprep.subr.bf16.mxu1 %v2580_v55  ;;  %v3112_v36 = vsel %vm4365_vm9, 0.0, %v2689_v26  ;;  %vm4372_vm9 = vnez %v4337_v15 }
  0x44   : > { %v3139_v43 = vsel %vm4372_vm9, 0.0, %v2689_v26 }
  0x46   : > { %2477 = vmatpush3.bf16.msra.mxu1 %v2580_v55 }
  0x48   : > { %2419 = vmatmul.mubr.msk.bf16.gmra.mrb[16].mxu0 %vm639_vm2, %v627_v29 }
  0x49   : > { %2422 = vmatprep.mubr.msk.bf16.mxu0 %vm2688_vm1, %v2687_v1  ;;  %2459 = vmatmul.mubr.msk.bf16.gmra.mrb[16].mxu1 %vm639_vm2, %v637_v32 }
  0x50   : > { %2423 = vmatmul.mubr.msk.bf16.gmra.mrb[20].mxu0 %vm639_vm2, %v628_v35 }
  0x51   : > { %2426 = vmatprep.mubr.msk.bf16.mxu0 %vm2688_vm1, %v2687_v1 }
  0x58   : > { %2427 = vmatmul.mubr.msk.bf16.gmra.mrb[24].mxu0 %vm639_vm2, %v629_v38 }
  0x59   : > { %2430 = vmatprep.mubr.msk.bf16.mxu0 %vm2688_vm1, %v2687_v1 }
  0x60   : > { %2431 = vmatmul.mubr.msk.bf16.gmra.mrb[28].mxu0 %vm639_vm2, %v630_v41 }
  0x61   : > { %2434 = vmatprep.mubr.msk.bf16.mxu0 %vm2688_vm1, %v2687_v1 }
  0x68   : > { %2435 = vmatmul.mubr.msk.bf16.gmra.mrb[32].mxu0 %vm639_vm2, %v631_v44 }
  0x69   : > { %2438 = vmatprep.mubr.msk.bf16.mxu0 %vm2688_vm1, %v2687_v1  ;;  %vm2943_vm1 = vmand %vm499_vm7, %vm509_vm8 }
  0x6a   : > { %v4317_v3 = vsel %vm2943_vm1, 4294967295, %v4316_v3  ;;  %vm2971_vm7 = vmand %vm2939_vm14, %vm4279_vm10  ;;  %vm512_vm14 = vcmp.le.s32.totalorder %v488_v19, 16 }
  0x6b   : > { %v4325_v8 = vsel %vm2971_vm7, 4294967295, %v4324_v8  ;;  %vm2975_vm8 = vmand %vm501_vm15, %vm511_vm0 }
  0x6c   : > { %vm2991_vm12 = vmand %vm2943_vm1, %vm4279_vm10  ;;  %vm4361_vm4 = vnez %v4325_v8  ;;  %v3175_v51 = vsel %vm2975_vm8, 0.0, %v2689_v26 }
  0x6d   : > { %v4331_v12 = vsel %vm2991_vm12, 4294967295, %v4330_v12  ;;  %vm2999_vm15 = vmand %vm2943_vm1, %vm4277_vm13  ;;  %vm4346_vm12 = vcmp.le.s32.totalorder %v2931_v62, 16  ;;  %v3098_v32 = vsel %vm4361_vm4, 0.0, %v2689_v26  ;;  %vm4367_vm4 = vnez %v4317_v3 }
  0x6e   : > { %v4333_v13 = vsel %vm2999_vm15, 4294967295, %v4332_v13  ;;  %vm3019_vm1 = vmand %vm2955_vm5, %vm4277_vm13  ;;  %vm505_vm13 = vcmp.ge.s32.totalorder %v491_v10, 1  ;;  %vm4366_vm6 = vnez %v4331_v12  ;;  %v3122_v38 = vsel %vm4367_vm4, 0.0, %v2689_v26 }
  0x6f   : > { %v4339_v16 = vsel %vm3019_vm1, 4294967295, %v4338_v16  ;;  %vm3027_vm15 = vmand %vm2975_vm8, %vm4279_vm10  ;;  %vm515_vm1 = vcmp.le.s32.totalorder %v491_v10, 16  ;;  %v3117_v37 = vsel %vm4366_vm6, 0.0, %v2689_v26  ;;  %vm4373_vm6 = vnez %v4321_v6 }
  0x70   : > { %2439 = vmatmul.mubr.msk.bf16.gmra.mrb[36].mxu0 %vm639_vm2, %v632_v47  ;;  %vm504_vm2 = vcmp.ge.s32.totalorder %v490_v0, 1  ;;  %v4341_v17 = vsel %vm3027_vm15, 4294967295, %v4340_v17  ;;  %v3144_v44 = vsel %vm4373_vm6, 0.0, %v2689_v26  ;;  %vm4374_vm4 = vnez %v4339_v16 }
  0x71   : > { %vm3003_vm0 = vmand %vm504_vm2, %vm514_vm3  ;;  %vm503_vm2 = vcmp.ge.s32.totalorder %v489_v4, 1  ;;  %vm513_vm3 = vcmp.le.s32.totalorder %v489_v4, 16  ;;  %v3149_v45 = vsel %vm4374_vm4, 0.0, %v2689_v26  ;;  %vm4379_vm9 = vnez %v4341_v17  ;;  %v3272_v17 = vld [vmem:[%s4270_s3] ss:$0 sm:$0xff] }
  0x72   : > { %vm3035_vm11 = vmand %vm3003_vm0, %vm4279_vm10  ;;  %v3165_v49 = vsel %vm4379_vm9, 0.0, %v2689_v26  ;;  %v3170_v50 = vsel %vm3003_vm0, 0.0, %v2689_v26  ;;  %vm4380_vm6 = vcmp.ge.s32.totalorder %v2928_v59, 1 }
  0x73   : > { %v4343_v18 = vsel %vm3035_vm11, 4294967295, %v4342_v18  ;;  %vm3039_vm5 = vmand %vm503_vm2, %vm513_vm3  ;;  %vm502_vm3 = vcmp.ge.s32.totalorder %v488_v19, 1 }
  0x74   : > { %vm3047_vm15 = vmand %vm3003_vm0, %vm4346_vm12  ;;  %v3292_v25 = vsel %vm3039_vm5, 0.0, %v2689_v26 }
  0x75   : > { %vm3051_vm10 = vmand %vm505_vm13, %vm515_vm1  ;;  %vm516_vm1 = vcmp.le.s32.totalorder %v492_v21, 16  ;;  %v3192_v58 = vsel %vm3047_vm15, 0.0, %v2689_v26  ;;  %vm4386_vm15 = vcmp.le.s32.totalorder %v2931_v62, 16  ;;  %4393 = vst [vmem:[#allocation5_spill] sm:$0xff] %v3292_v25 }
  0x76   : > { %vm4351_vm11 = vmmov %vm4346_vm12  ;;  %v3211_v1 = vsel %vm3051_vm10, 0.0, %v2689_v26 }
  0x77   : > { %vm3059_vm2 = vmand %vm3039_vm5, %vm4351_vm11 }
  0x78   : > { %vm4354_vm7 = vmmov %vm4351_vm11  ;;  %vm4358_vm11 = vcmp.ge.s32.totalorder %v2928_v59, 1  ;;  %v613_v56 = vsel %vm3059_vm2, 0.0, %v2689_v26 }
  0x79   : > { %vm3067_vm12 = vmand %vm2975_vm8, %vm4354_vm7 }
  0x7a   : > { %vm3083_vm7 = vmand %vm3051_vm10, %vm4358_vm11  ;;  %vm4362_vm11 = vnez %v4315_v2  ;;  %v3216_v2 = vsel %vm3067_vm12, 0.0, %v2689_v26 }
  0x7b   : > { %v3103_v33 = vsel %vm4362_vm11, 0.0, %v2689_v26  ;;  %vm3105_vm13 = vmand %vm502_vm3, %vm512_vm14  ;;  %vm4368_vm14 = vnez %v4333_v13  ;;  %vm4369_vm3 = vcmp.ge.s32.totalorder %v492_v21, 1  ;;  %v3206_v0 = vsel %vm3083_vm7, 0.0, %v2689_v26 }
  0x7c   : > { %v3127_v39 = vsel %vm4368_vm14, 0.0, %v2689_v26  ;;  %vm3131_vm11 = vmand %vm4369_vm3, %vm516_vm1  ;;  %vm4375_vm1 = vcmp.le.s32.totalorder %v2931_v62, 16  ;;  %vm4378_vm3 = vnez %v4343_v18  ;;  %v3282_v21 = vsel %vm3105_vm13, 0.0, %v2689_v26 }
  0x7d   : > { %vm3155_vm14 = vmand %vm3051_vm10, %vm4375_vm1  ;;  %v614_v48 = vsel %vm4378_vm3, 0.0, %v2689_v26  ;;  %vm1043_vm1 = vcmask 1046528   ;;  %vm1169_vm10 = vcmask 1045504   ;;  %v3263_v62 = vsel %vm3131_vm11, 0.0, %v2689_v26 }
  0x7e   : > { %vm3181_vm4 = vmand %vm3105_vm13, %vm4380_vm6  ;;  %v3234_v8 = vsel %vm3155_vm14, 0.0, %v2689_v26 }
  0x7f   : > { %vm4383_vm8 = vmmov %vm4380_vm6  ;;  %v3239_v9 = vsel %vm3181_vm4, 0.0, %v2689_v26 }
  0x80   : > { %vm3198_vm0 = vmand %vm3131_vm11, %vm4383_vm8 }
  0x81   : > { %vm3222_vm2 = vmand %vm3131_vm11, %vm4386_vm15  ;;  %v3258_v15 = vsel %vm3198_vm0, 0.0, %v2689_v26 }
  0x82   : > { %vm4389_vm12 = vmmov %vm4386_vm15  ;;  %v3277_v19 = vsel %vm3222_vm2, 0.0, %v2689_v26 }
  0x83   : > { %vm3245_vm7 = vmand %vm3105_vm13, %vm4389_vm12 }
  0x84   : > { %vm4392_vm14 = vmmov %vm4380_vm6  ;;  %v3287_v24 = vsel %vm3245_vm7, 0.0, %v2689_v26 }
  0x85   : > { %vm548_vm3 = vmand %vm3039_vm5, %vm4392_vm14 }
  0xfb   : > { %v723_v35 = vpop.f32.mrb[0].mxu0 }
  0xfc   : > { %v849_v41 = vadd.f32 %v3077_v28, %v723_v35  ;;  %v2404_v42 = vpop.f32.mrb[1].mxu0  ;;  %v803_v57 = vpop.f32.mrb[0].mxu1  ;;  %v3297_v35 = vsel %vm548_vm3, 0.0, %v2689_v26 }
  0xfd   : > { %v726_v47 = vpop.f32.mrb[2].mxu0  ;;  %v869_v61 = vadd.f32 %v3077_v28, %v803_v57  ;;  %v2444_v63 = vpop.f32.mrb[1].mxu1  ;;  %4394 = vst [vmem:[#allocation6_spill] sm:$0xff] %v3297_v35 }
  0xfe   : > { %v879_v53 = vadd.f32 %v849_v41, %v593_v27  ;;  %v850_v54 = vadd.f32 %v3077_v28, %v726_v47  ;;  %v2405_v55 = vpop.f32.mrb[3].mxu0  ;;  %v806_v7 = vpop.f32.mrb[2].mxu1 }
  0xff   : > { %v899_v12 = vadd.f32 %v869_v61, %v613_v56  ;;  %v870_v13 = vadd.f32 %v3077_v28, %v806_v7  ;;  %v2445_v14 = vpop.f32.mrb[3].mxu1 }
 0x100   : > { %v909_v4 = vmax.f32 %v879_v53, 0.0  ;;  %v880_v6 = vadd.f32 %v850_v54, %v594_v30 }
 0x101   : > { %v929_v22 = vmax.f32 %v899_v12, 0.0  ;;  %v900_v23 = vadd.f32 %v870_v13, %v614_v48 }
 0x102   : > { %v939_v16 = vmin.f32 %v909_v4, 6.0  ;;  %v910_v18 = vmax.f32 %v880_v6, 0.0 }
 0x103   : > { %v731_v59 = vpop.f32.mrb[4].mxu0  ;;  %v3301_v46 = vmin.f32 %v929_v22, 6.0  ;;  %v930_v47 = vmax.f32 %v900_v23, 0.0 }
 0x104   : > { %v995_v27 = vmul.f32 %v3229_v5, %v939_v16  ;;  %v1121_v29 = vmul.f32 %v3252_v11, %v939_v16  ;;  %v940_v30 = vmin.f32 %v910_v18, 6.0  ;;  %v2408_v34 = vpop.f32.mrb[5].mxu0  ;;  %v974_v40 = vmul.f32 %v3272_v17, %v939_v16  ;;  %v811_v55 = vpop.f32.mrb[4].mxu1 }
 0x105   : > { %v851_v41 = vadd.f32 %v3077_v28, %v731_v59  ;;  %v734_v42 = vpop.f32.mrb[6].mxu0  ;;  %4395 = vst [vmem:[#allocation7_spill] sm:$0xff] %v3301_v46  ;;  %v3315_v61 = vmul.f32 %v3229_v5, %v3301_v46  ;;  %v2448_v63 = vpop.f32.mrb[5].mxu1  ;;  %v3319_v4 = vmul.f32 %v3252_v11, %v3301_v46  ;;  %v3325_v6 = vmin.f32 %v930_v47, 6.0 }
 0x106   : > { %v1044_v20 = vrot.slane %v995_v27, 1  ;;  %v1170_v48 = vrot.slane %v1121_v29, 2  ;;  %v975_v52 = vmul.f32 %v3272_v17, %v940_v30  ;;  %v996_v53 = vmul.f32 %v3229_v5, %v940_v30  ;;  %v2409_v54 = vpop.f32.mrb[7].mxu0  ;;  %v814_v7 = vpop.f32.mrb[6].mxu1 }
 0x107   : > { %v1122_v56 = vmul.f32 %v3252_v11, %v940_v30  ;;  %v881_v26 = vadd.f32 %v851_v41, %v3093_v31  ;;  %v852_v57 = vadd.f32 %v3077_v28, %v734_v42  ;;  %4396 = vst [vmem:[#allocation8_spill] sm:$0xff] %v3315_v61  ;;  %4397 = vst [vmem:[#allocation9_spill] sm:$0xff] %v3319_v4  ;;  %v2449_v16 = vpop.f32.mrb[7].mxu1 }
 0x108   : > { %v1045_v3 = vrot.slane %v996_v53, 1  ;;  %v3323_v31 = vmul.f32 %v3311_v60, %v3301_v46  ;;  %4399 = vst [vmem:[#allocation11_spill] sm:$0xff] %v3325_v6  ;;  %v871_v23 = vadd.f32 %v3077_v28, %v811_v55  ;;  %v872_v53 = vadd.f32 %v3077_v28, %v814_v7 }
 0x109   : > { %v1171_v10 = vrot.slane %v1122_v56, 2  ;;  %v911_v12 = vmax.f32 %v881_v26, 0.0  ;;  %v882_v13 = vadd.f32 %v852_v57, %v3098_v32 }
 0x10a   : > { %4398 = vst [vmem:[#allocation10_spill] sm:$0xff] %v3323_v31  ;;  %v1046_v18 = vsel %vm1043_vm1, %v1044_v20, %v1045_v3  ;;  %v901_v47 = vadd.f32 %v871_v23, %v3170_v50  ;;  %v3339_v20 = vmul.f32 %v3272_v17, %v3325_v6  ;;  %v902_v7 = vadd.f32 %v872_v53, %v3192_v58 }
 0x10b   : > { %v1100_v27 = vadd.f32 %v1046_v18, %v974_v40  ;;  %v1172_v29 = vsel %vm1169_vm10, %v1170_v48, %v1171_v10  ;;  %v941_v30 = vmin.f32 %v911_v12, 6.0  ;;  %v912_v34 = vmax.f32 %v882_v13, 0.0  ;;  %v739_v41 = vpop.f32.mrb[8].mxu0 }
 0x10c   : > { %v853_v42 = vadd.f32 %v3077_v28, %v739_v41  ;;  %v2412_v32 = vpop.f32.mrb[9].mxu0  ;;  %v931_v63 = vmax.f32 %v901_v47, 0.0  ;;  %v819_v12 = vpop.f32.mrb[8].mxu1 }
 0x10d   : > { %v3341_v54 = vadd.f32 %v1172_v29, %v1100_v27  ;;  %v997_v40 = vmul.f32 %v3229_v5, %v941_v30  ;;  %v1123_v48 = vmul.f32 %v3252_v11, %v941_v30  ;;  %v3345_v55 = vmin.f32 %v912_v34, 6.0  ;;  %v742_v56 = vpop.f32.mrb[10].mxu0  ;;  %v2452_v27 = vpop.f32.mrb[9].mxu1 }
 0x10e   : > { %v883_v26 = vadd.f32 %v853_v42, %v3103_v33  ;;  %v854_v57 = vadd.f32 %v3077_v28, %v742_v56  ;;  %v2413_v50 = vpop.f32.mrb[11].mxu0  ;;  %v822_v34 = vpop.f32.mrb[10].mxu1  ;;  %v3363_v47 = vmin.f32 %v931_v63, 6.0 }
 0x10f   : > { %v1047_v13 = vrot.slane %v997_v40, 1  ;;  %v1173_v16 = vrot.slane %v1123_v48, 2  ;;  %v976_v18 = vmul.f32 %v3272_v17, %v3345_v55  ;;  %v998_v23 = vmul.f32 %v3229_v5, %v3345_v55  ;;  %v2453_v53 = vpop.f32.mrb[11].mxu1 }
 0x110   : > { %v1124_v29 = vmul.f32 %v3252_v11, %v3345_v55  ;;  %v3358_v33 = vmul.f32 %v3311_v60, %v3345_v55  ;;  %v913_v30 = vmax.f32 %v883_v26, 0.0  ;;  %v884_v58 = vadd.f32 %v854_v57, %v3112_v36  ;;  %4400 = vst [vmem:[#allocation12_spill] sm:$0xff] %v3363_v47 }
 0x111   : > { %v1048_v41 = vsel %vm1043_vm1, %v1045_v3, %v1047_v13  ;;  %v1174_v42 = vsel %vm1169_vm10, %v1171_v10, %v1173_v16  ;;  %v1049_v32 = vrot.slane %v998_v23, 1  ;;  %v932_v26 = vmax.f32 %v902_v7, 0.0 }
 0x112   : > { %v1101_v40 = vadd.f32 %v1048_v41, %v975_v52  ;;  %v1175_v48 = vrot.slane %v1124_v29, 2  ;;  %v3366_v50 = vmin.f32 %v913_v30, 6.0  ;;  %v914_v27 = vmax.f32 %v884_v58, 0.0 }
 0x113   : > { %v747_v59 = vpop.f32.mrb[12].mxu0  ;;  %v873_v36 = vadd.f32 %v3077_v28, %v819_v12  ;;  %v874_v57 = vadd.f32 %v3077_v28, %v822_v34  ;;  %v3383_v29 = vmin.f32 %v932_v26, 6.0 }
 0x114   : > { %v3370_v3 = vadd.f32 %v1174_v42, %v1101_v40  ;;  %v977_v10 = vmul.f32 %v3272_v17, %v3366_v50  ;;  %v999_v52 = vmul.f32 %v3229_v5, %v3366_v50  ;;  %v1125_v63 = vmul.f32 %v3252_v11, %v3366_v50  ;;  %v2416_v13 = vpop.f32.mrb[13].mxu0  ;;  %v827_v53 = vpop.f32.mrb[12].mxu1 }
 0x115   : > { %v944_v16 = vmin.f32 %v914_v27, 6.0  ;;  %v3380_v7 = vmul.f32 %v3311_v60, %v3366_v50  ;;  %v855_v12 = vadd.f32 %v3077_v28, %v747_v59  ;;  %v750_v23 = vpop.f32.mrb[14].mxu0  ;;  %4401 = vst [vmem:[#allocation13_spill] sm:$0xff] %v3383_v29  ;;  %v903_v42 = vadd.f32 %v873_v36, %v3206_v0  ;;  %v3394_v59 = vld [vmem:[%s4270_s3 + $0x6] ss:$0 sm:$0xff]  ;;  %v2456_v26 = vpop.f32.mrb[13].mxu1 }
 0x116   : > { %v1050_v30 = vrot.slane %v999_v52, 1  ;;  %v1176_v58 = vrot.slane %v1125_v63, 2  ;;  %v856_v34 = vadd.f32 %v3077_v28, %v750_v23  ;;  %v2417_v41 = vpop.f32.mrb[15].mxu0  ;;  %v3402_v23 = vpop.f32.mrb[14].mxu1 }
 0x117   : > { %v1000_v40 = vmul.f32 %v3229_v5, %v944_v16  ;;  %v1126_v27 = vmul.f32 %v3252_v11, %v944_v16  ;;  %v1287_v13 = vmul.f32 %v3311_v60, %v944_v16  ;;  %v1334_v14 = vrot.slane %v3380_v7, 1  ;;  %v2457_v4 = vpop.f32.mrb[15].mxu1 }
 0x118   : > { %v1051_v52 = vsel %vm1043_vm1, %v1049_v32, %v1050_v30  ;;  %v1177_v63 = vsel %vm1169_vm10, %v1175_v48, %v1176_v58  ;;  %v3399_v0 = vmul.f32 %v3394_v59, %v944_v16  ;;  %v885_v36 = vadd.f32 %v855_v12, %v3117_v37 }
 0x119   : > { %v1052_v41 = vrot.slane %v1000_v40, 1  ;;  %v1102_v22 = vadd.f32 %v1051_v52, %v976_v18  ;;  %v1178_v7 = vrot.slane %v1126_v27, 2  ;;  %v1336_v56 = vrot.slane %v1287_v13, 1 }
 0x11a   : > { %v915_v31 = vmax.f32 %v885_v36, 0.0  ;;  %v886_v26 = vadd.f32 %v856_v34, %v3122_v38  ;;  %v3408_v32 = vmul.f32 %v3229_v5, %v3383_v29 }
 0x11b   : > { %v1053_v48 = vsel %vm1043_vm1, %v1050_v30, %v1052_v41  ;;  %v1179_v37 = vsel %vm1169_vm10, %v1176_v58, %v1178_v7  ;;  %v3412_v16 = vadd.f32 %v1177_v63, %v1102_v22  ;;  %v3415_v18 = vsel %vm1043_vm1, %v1334_v14, %v1336_v56  ;;  %v755_v12 = vpop.f32.mrb[16].mxu0 }
 0x11c   : > { %v1103_v4 = vadd.f32 %v1053_v48, %v977_v10  ;;  %v3417_v40 = vmin.f32 %v915_v31, 6.0  ;;  %v916_v27 = vmax.f32 %v886_v26, 0.0  ;;  %v857_v38 = vadd.f32 %v3077_v28, %v755_v12  ;;  %v2420_v34 = vpop.f32.mrb[17].mxu0  ;;  %v3432_v31 = vld [vmem:[%s4270_s3 + $0x4] ss:$0 sm:$0xff]  ;;  %v3440_v7 = vpop.f32.mrb[16].mxu1 }
 0x11d   : > { %v758_v13 = vpop.f32.mrb[18].mxu0  ;;  %v3423_v30 = vmul.f32 %v3252_v11, %v3383_v29  ;;  %v3427_v22 = vmul.f32 %v3311_v60, %v3383_v29  ;;  %v933_v56 = vmax.f32 %v903_v42, 0.0  ;;  %v904_v12 = vadd.f32 %v874_v57, %v3211_v1  ;;  %v2460_v34 = vpop.f32.mrb[17].mxu1 }
 0x11e   : > { %v3434_v10 = vadd.f32 %v1179_v37, %v1103_v4  ;;  %v3436_v58 = vmin.f32 %v916_v27, 6.0  ;;  %v887_v63 = vadd.f32 %v857_v38, %v3127_v39  ;;  %v858_v36 = vadd.f32 %v3077_v28, %v758_v13  ;;  %v2421_v41 = vpop.f32.mrb[19].mxu0  ;;  %v3451_v38 = vpop.f32.mrb[18].mxu1 }
 0x11f   : > { %4402 = vst [vmem:[#allocation14_spill] sm:$0xff] %v3427_v22  ;;  %v3444_v48 = vmin.f32 %v933_v56, 6.0  ;;  %v875_v27 = vadd.f32 %v3077_v28, %v827_v53  ;;  %v1248_v39 = vmul.f32 %v3432_v31, %v3345_v55  ;;  %v934_v13 = vmax.f32 %v904_v12, 0.0  ;;  %v2461_v57 = vpop.f32.mrb[19].mxu1 }
 0x120   : > { %v917_v37 = vmax.f32 %v887_v63, 0.0  ;;  %v888_v4 = vadd.f32 %v858_v36, %v3139_v43  ;;  %v1249_v41 = vmul.f32 %v3432_v31, %v3366_v50  ;;  %v4404_v56 = vrot.slane %v3358_v33, 1 }
 0x121   : > { %4403 = vst [vmem:[#allocation15_spill] sm:$0xff] %v3444_v48  ;;  %v1410_v1 = vmul.f32 %v3394_v59, %v3345_v55  ;;  %v905_v63 = vadd.f32 %v875_v27, %v3234_v8  ;;  %v1264_v36 = vadd.f32 %v1248_v39, %v3341_v54  ;;  %v3464_v12 = vmin.f32 %v934_v13, 6.0 }
 0x122   : > { %v1335_v42 = vsel %vm1043_vm1, %v4404_v56, %v1334_v14  ;;  %v3460_v43 = vmin.f32 %v917_v37, 6.0  ;;  %v918_v53 = vmax.f32 %v888_v4, 0.0  ;;  %v1265_v26 = vadd.f32 %v1249_v41, %v3370_v3  ;;  %v3496_v56 = vld [vmem:[%s4270_s3 + $0x8] ss:$0 sm:$0xff] }
 0x123   : > { %v763_v34 = vpop.f32.mrb[20].mxu0  ;;  %v1411_v33 = vmul.f32 %v3394_v59, %v3366_v50  ;;  %v1458_v14 = vrot.slane %v1410_v1, 2  ;;  %v3488_v50 = vld [vmem:[%s4270_s3 + $0x9] ss:$0 sm:$0xff]  ;;  %v935_v13 = vmax.f32 %v905_v63, 0.0  ;;  %v1389_v41 = vadd.f32 %v1335_v42, %v1264_v36 }
 0x124   : > { %v3471_v55 = vmul.f32 %v3229_v5, %v3460_v43  ;;  %v3475_v37 = vmul.f32 %v3252_v11, %v3460_v43  ;;  %v3479_v8 = vmul.f32 %v3311_v60, %v3460_v43  ;;  %v3483_v54 = vmul.f32 %v3394_v59, %v3460_v43  ;;  %v2424_v3 = vpop.f32.mrb[21].mxu0 }
 0x125   : > { %v3490_v4 = vmin.f32 %v918_v53, 6.0  ;;  %v859_v27 = vadd.f32 %v3077_v28, %v763_v34  ;;  %v766_v39 = vpop.f32.mrb[22].mxu0  ;;  %v965_v63 = vmin.f32 %v935_v13, 6.0  ;;  %v1390_v42 = vadd.f32 %v3415_v18, %v1265_v26 }
 0x126   : > { %4405 = vst [vmem:[#allocation16_spill] sm:$0xff] %v3471_v55  ;;  %4406 = vst [vmem:[#allocation17_spill] sm:$0xff] %v3475_v37  ;;  %v2425_v53 = vpop.f32.mrb[23].mxu0  ;;  %v860_v34 = vadd.f32 %v3077_v28, %v766_v39  ;;  %v1459_v36 = vrot.slane %v1411_v33, 2  ;;  %v1536_v22 = vmul.f32 %v3496_v56, %v3417_v40  ;;  %v1537_v1 = vmul.f32 %v3496_v56, %v3436_v58 }
 0x127   : > { %4407 = vst [vmem:[#allocation18_spill] sm:$0xff] %v3483_v54  ;;  %v889_v61 = vadd.f32 %v859_v27, %v3144_v44  ;;  %v1573_v57 = vmul.f32 %v3488_v50, %v3417_v40  ;;  %v3515_v44 = vld [vmem:[%s4270_s3 + $0xa] ss:$0 sm:$0xff]  ;;  %v3518_v18 = vmul.f32 %v3311_v60, %v965_v63  ;;  %v3521_v26 = vmul.f32 %v3394_v59, %v965_v63 }
 0x128   : > { %v890_v53 = vadd.f32 %v860_v34, %v3149_v45  ;;  %v3524_v33 = vmul.f32 %v3488_v50, %v965_v63  ;;  %v3527_v27 = vmul.f32 %v3515_v44, %v965_v63  ;;  %v4410_v45 = vrot.slane %v3399_v0, 2 }
 0x129   : > { %v919_v3 = vmax.f32 %v889_v61, 0.0  ;;  %v1460_v61 = vsel %vm1169_vm10, %v1458_v14, %v1459_v36  ;;  %v1621_v63 = vrot.slane %v1573_v57, 1 }
 0x12a   : > { %4408 = vst [vmem:[#allocation19_spill] sm:$0xff] %v3524_v33  ;;  %4409 = vst [vmem:[#allocation20_spill] sm:$0xff] %v3527_v27  ;;  %v1462_v39 = vsel %vm1169_vm10, %v1459_v36, %v4410_v45  ;;  %v920_v34 = vmax.f32 %v890_v53, 0.0  ;;  %v1514_v14 = vadd.f32 %v1460_v61, %v1389_v41  ;;  %v1575_v53 = vmul.f32 %v3488_v50, %v3460_v43 }
 0x12b   : > { %v3533_v13 = vmin.f32 %v919_v3, 6.0  ;;  %v771_v52 = vpop.f32.mrb[24].mxu0  ;;  %v1515_v36 = vadd.f32 %v1462_v39, %v1390_v42  ;;  %v1574_v3 = vmul.f32 %v3488_v50, %v3436_v58 }
 0x12c   : > { %v861_v37 = vadd.f32 %v3077_v28, %v771_v52  ;;  %v2428_v55 = vpop.f32.mrb[25].mxu0  ;;  %v3540_v35 = vmin.f32 %v920_v34, 6.0  ;;  %v1552_v46 = vadd.f32 %v1536_v22, %v1514_v14  ;;  %v1624_v54 = vrot.slane %v1575_v53, 1 }
 0x12d   : > { %v774_v0 = vpop.f32.mrb[26].mxu0  ;;  %v1553_v39 = vadd.f32 %v1537_v1, %v1515_v36  ;;  %v1622_v33 = vrot.slane %v1574_v3, 1  ;;  %v1699_v1 = vmul.f32 %v3515_v44, %v3436_v58  ;;  %v1700_v36 = vmul.f32 %v3515_v44, %v3460_v43 }
 0x12e   : > { %4411 = vst [vmem:[#allocation21_spill] sm:$0xff] %v3540_v35  ;;  %v891_v45 = vadd.f32 %v861_v37, %v3165_v49  ;;  %v862_v52 = vadd.f32 %v3077_v28, %v774_v0  ;;  %v2429_v55 = vpop.f32.mrb[27].mxu0  ;;  %v3550_v41 = vmul.f32 %v3229_v5, %v3540_v35  ;;  %v3554_v42 = vmul.f32 %v3252_v11, %v3540_v35 }
 0x12f   : > { %v3558_v61 = vmul.f32 %v3311_v60, %v3540_v35  ;;  %v3562_v49 = vmul.f32 %v3488_v50, %v3540_v35  ;;  %v3566_v22 = vmul.f32 %v3515_v44, %v3540_v35  ;;  %v876_v3 = vadd.f32 %v3077_v28, %v3402_v23 }
 0x130   : > { %4412 = vst [vmem:[#allocation22_spill] sm:$0xff] %v3550_v41  ;;  %4413 = vst [vmem:[#allocation23_spill] sm:$0xff] %v3554_v42  ;;  %v921_v37 = vmax.f32 %v891_v45, 0.0  ;;  %v892_v57 = vadd.f32 %v862_v52, %v3175_v51  ;;  %v1698_v51 = vmul.f32 %v3515_v44, %v3417_v40  ;;  %v1747_v25 = vrot.slane %v1699_v1, 2 }
 0x131   : > { %v1749_v42 = vrot.slane %v1700_v36, 2  ;;  %v906_v23 = vadd.f32 %v876_v3, %v3258_v15 }
 0x132   : > { %v3574_v29 = vmin.f32 %v921_v37, 6.0  ;;  %v922_v27 = vmax.f32 %v892_v57, 0.0  ;;  %v1623_v37 = vsel %vm1043_vm1, %v1621_v63, %v1622_v33  ;;  %v1625_v57 = vsel %vm1043_vm1, %v1622_v33, %v1624_v54  ;;  %v3595_v63 = vld [vmem:[%s4271_s4] ss:$0 sm:$0xff] }
 0x133   : > { %v779_v35 = vpop.f32.mrb[28].mxu0  ;;  %v1677_v34 = vadd.f32 %v1623_v37, %v1552_v46  ;;  %v1746_v0 = vrot.slane %v1698_v51, 2  ;;  %v1016_v46 = vmul.f32 %v3229_v5, %v3325_v6  ;;  %v1142_v37 = vmul.f32 %v3252_v11, %v3325_v6 }
 0x134   : > { %v3582_v45 = vmin.f32 %v922_v27, 6.0  ;;  %v863_v52 = vadd.f32 %v3077_v28, %v779_v35  ;;  %v2432_v14 = vpop.f32.mrb[29].mxu0  ;;  %v1678_v27 = vadd.f32 %v1625_v57, %v1553_v39 }
 0x135   : > { %v782_v53 = vpop.f32.mrb[30].mxu0  ;;  %v1748_v35 = vsel %vm1169_vm10, %v1746_v0, %v1747_v25  ;;  %v936_v0 = vmax.f32 %v906_v23, 0.0  ;;  %v1079_v51 = vrot.slane %v1016_v46, 1 }
 0x136   : > { %v893_v55 = vadd.f32 %v863_v52, %v3216_v2  ;;  %v864_v43 = vadd.f32 %v3077_v28, %v782_v53  ;;  %v2433_v41 = vpop.f32.mrb[31].mxu0  ;;  %v1017_v2 = vmul.f32 %v3229_v5, %v3363_v47  ;;  %v1802_v39 = vadd.f32 %v1748_v35, %v1677_v34 }
 0x137   : > { %v1750_v41 = vsel %vm1169_vm10, %v1747_v25, %v1749_v42  ;;  %v1143_v25 = vmul.f32 %v3252_v11, %v3363_v47 }
 0x138   : > { %v923_v54 = vmax.f32 %v893_v55, 0.0  ;;  %v894_v33 = vadd.f32 %v864_v43, %v3239_v9  ;;  %v1803_v14 = vadd.f32 %v1750_v41, %v1678_v27  ;;  %v1080_v1 = vrot.slane %v1017_v2, 1 }
 0x139   : > { %v1825_v15 = vadd.f32 %v3595_v63, %v1802_v39  ;;  %v966_v55 = vmin.f32 %v936_v0, 6.0  ;;  %v1205_v2 = vrot.slane %v1142_v37, 2  ;;  %v1307_v37 = vmul.f32 %v3311_v60, %v3464_v12 }
 0x13a   : > { %v3604_v36 = vmin.f32 %v923_v54, 6.0  ;;  %v924_v52 = vmax.f32 %v894_v33, 0.0  ;;  %v1826_v3 = vadd.f32 %v3595_v63, %v1803_v14  ;;  %v1081_v9 = vsel %vm1043_vm1, %v1079_v51, %v1080_v1 }
 0x13b   : > { %v787_v42 = vpop.f32.mrb[32].mxu0  ;;  %v1841_v35 = vmax.f32 %v1825_v15, 0.0  ;;  %v1114_v46 = vadd.f32 %v1081_v9, %v3339_v20  ;;  %v1206_v14 = vrot.slane %v1143_v25, 2  ;;  %v1306_v15 = vmul.f32 %v3311_v60, %v3444_v48 }
 0x13c   : > { %v3615_v34 = vmul.f32 %v3229_v5, %v3604_v36  ;;  %v3619_v53 = vmul.f32 %v3252_v11, %v3604_v36  ;;  %v3623_v57 = vmul.f32 %v3311_v60, %v3604_v36  ;;  %v3625_v43 = vmin.f32 %v924_v52, 6.0  ;;  %v2436_v27 = vpop.f32.mrb[33].mxu0 }
 0x13d   : > { %v1842_v23 = vmax.f32 %v1826_v3, 0.0  ;;  %v790_v54 = vpop.f32.mrb[34].mxu0  ;;  %v1857_v51 = vmin.f32 %v1841_v35, 6.0  ;;  %v1262_v52 = vmul.f32 %v3432_v31, %v3444_v48  ;;  %v1207_v20 = vsel %vm1169_vm10, %v1205_v2, %v1206_v14 }
 0x13e   : > { %4414 = vst [vmem:[#allocation24_spill] sm:$0xff] %v3619_v53  ;;  %v2437_v0 = vpop.f32.mrb[35].mxu0  ;;  %v1431_v3 = vmul.f32 %v3394_v59, %v3444_v48  ;;  %v1432_v9 = vmul.f32 %v3394_v59, %v3464_v12  ;;  %v1240_v27 = vadd.f32 %v1207_v20, %v1114_v46  ;;  %v1368_v35 = vrot.slane %v1306_v15, 1 }
 0x13f   : > { %v1858_v6 = vmin.f32 %v1842_v23, 6.0  ;;  %v1550_v23 = vmul.f32 %v3496_v56, %v966_v55  ;;  %v1369_v0 = vrot.slane %v1307_v37, 1  ;;  %v3644_v39 = vmul.f32 %v3488_v50, %v966_v55 }
 0x140   : > { %v1493_v41 = vrot.slane %v1431_v3, 2  ;;  %v1494_v33 = vrot.slane %v1432_v9, 2  ;;  %v1278_v2 = vadd.f32 %v1262_v52, %v1240_v27  ;;  %v3647_v53 = vmul.f32 %v3515_v44, %v966_v55 }
 0x141   : > { %v1873_v25 = vpack.c.bf16 %v1858_v6, %v1857_v51  ;;  %v877_v48 = vadd.f32 %v3077_v28, %v3440_v7  ;;  %v989_v6 = vmul.f32 %v3272_v17, %v3363_v47  ;;  %v1370_v51 = vsel %vm1043_vm1, %v1368_v35, %v1369_v0 }
 0x142   : > { %v1495_v15 = vsel %vm1169_vm10, %v1493_v41, %v1494_v33  ;;  %v4415_v37 = vrot.slane %v3408_v32, 1  ;;  %v1403_v3 = vadd.f32 %v1370_v51, %v1278_v2  ;;  %v4416_v47 = vrot.slane %v3423_v30, 2 }
 0x143   : > { %2478 = vmatprep.mubr.bf16.mxu1 %v1873_v25  ;;  %v3653_v46 = vpop.f32.mrb[36].mxu0  ;;  %v907_v7 = vadd.f32 %v877_v48, %v3263_v62  ;;  %v1263_v41 = vmul.f32 %v3432_v31, %v3464_v12  ;;  %v4417_v32 = vrot.slane %v3518_v18, 1  ;;  %v4418_v2 = vrot.slane %v3521_v26, 2 }
 0x144   : > { %v1083_v52 = vsel %vm1043_vm1, %v1080_v1, %v4415_v37  ;;  %v2440_v55 = vpop.f32.mrb[37].mxu0  ;;  %v1209_v35 = vsel %vm1169_vm10, %v1206_v14, %v4416_v47  ;;  %v1528_v62 = vadd.f32 %v1495_v15, %v1403_v3  ;;  %v878_v30 = vadd.f32 %v3077_v28, %v3451_v38 }
 0x145   : > { %v1115_v25 = vadd.f32 %v1083_v52, %v989_v6  ;;  %v3663_v27 = vpop.f32.mrb[38].mxu0  ;;  %v1372_v1 = vsel %vm1043_vm1, %v1369_v0, %v4417_v32  ;;  %v1497_v51 = vsel %vm1169_vm10, %v1494_v33, %v4418_v2  ;;  %v937_v48 = vmax.f32 %v907_v7, 0.0 }
 0x146   : > { %v2441_v37 = vpop.f32.mrb[39].mxu0  ;;  %v865_v47 = vadd.f32 %v3077_v28, %v787_v42  ;;  %v866_v14 = vadd.f32 %v3077_v28, %v790_v54  ;;  %v1250_v18 = vmul.f32 %v3432_v31, %v3417_v40  ;;  %v1251_v0 = vmul.f32 %v3432_v31, %v3436_v58 }
 0x147   : > { %v1241_v6 = vadd.f32 %v1209_v35, %v1115_v25  ;;  %v3684_v26 = vadd.f32 %v1550_v23, %v1528_v62  ;;  %v967_v33 = vmin.f32 %v937_v48, 6.0  ;;  %v908_v15 = vadd.f32 %v878_v30, %v3277_v19 }
 0x148   : > { %v895_v55 = vadd.f32 %v865_v47, %v3282_v21  ;;  %v896_v38 = vadd.f32 %v866_v14, %v3287_v24  ;;  %v1266_v42 = vadd.f32 %v1250_v18, %v3412_v16  ;;  %v1267_v54 = vadd.f32 %v1251_v0, %v3434_v10 }
 0x149   : > { %v1279_v52 = vadd.f32 %v1263_v41, %v1241_v6  ;;  %v1551_v7 = vmul.f32 %v3496_v56, %v967_v33  ;;  %v3693_v25 = vmul.f32 %v3488_v50, %v967_v33  ;;  %v3696_v23 = vmul.f32 %v3515_v44, %v967_v33 }
 0x14a   : > { %v938_v35 = vmax.f32 %v908_v15, 0.0  ;;  %v925_v41 = vmax.f32 %v895_v55, 0.0  ;;  %v926_v19 = vmax.f32 %v896_v38, 0.0  ;;  %v1288_v21 = vmul.f32 %v3311_v60, %v3417_v40 }
 0x14b   : > { %v1404_v3 = vadd.f32 %v1372_v1, %v1279_v52  ;;  %v4304_v16 = vrot.slane %v3693_v25, 1  ;;  %v1289_v32 = vmul.f32 %v3311_v60, %v3436_v58  ;;  %v1413_v30 = vmul.f32 %v3394_v59, %v3417_v40 }
 0x14c   : > { %v968_v1 = vmin.f32 %v938_v35, 6.0  ;;  %v3704_v2 = vmin.f32 %v925_v41, 6.0  ;;  %v3706_v37 = vmin.f32 %v926_v19, 6.0  ;;  %v1338_v62 = vrot.slane %v1288_v21, 1 }
 0x14d   : > { %v1529_v24 = vadd.f32 %v1497_v51, %v1404_v3  ;;  %v1339_v6 = vrot.slane %v1289_v32, 1  ;;  %v1414_v51 = vmul.f32 %v3394_v59, %v3436_v58  ;;  %v4419_v15 = vrot.slane %v3479_v8, 1 }
 0x14e   : > { %v1596_v47 = vmul.f32 %v3488_v50, %v968_v1  ;;  %v3716_v14 = vmul.f32 %v3515_v44, %v968_v1  ;;  %v3720_v18 = vmul.f32 %v3229_v5, %v3706_v37  ;;  %v3724_v0 = vmul.f32 %v3252_v11, %v3706_v37 }
 0x14f   : > { %v3708_v48 = vadd.f32 %v1551_v7, %v1529_v24  ;;  %v3728_v33 = vmul.f32 %v3311_v60, %v3706_v37  ;;  %v1340_v52 = vsel %vm1043_vm1, %v1338_v62, %v1339_v6  ;;  %v1342_v55 = vsel %vm1043_vm1, %v1339_v6, %v4419_v15 }
 0x150   : > { %v1463_v38 = vrot.slane %v1413_v30, 2  ;;  %v1659_v3 = vrot.slane %v1596_v47, 1  ;;  %v1072_v35 = vrot.slane %v3720_v18, 1  ;;  %v1391_v21 = vadd.f32 %v1340_v52, %v1266_v42  ;;  %v4420_v47 = vld [vmem:[#allocation18_spill] sm:$0xff] }
 0x151   : > { %v1356_v19 = vrot.slane %v3728_v33, 1  ;;  %v1392_v24 = vadd.f32 %v1342_v55, %v1267_v54  ;;  %v1464_v32 = vrot.slane %v1414_v51, 2  ;;  %v1538_v8 = vmul.f32 %v3496_v56, %v3490_v4 }
 0x152   : > { %v3741_v1 = vsel %vm1043_vm1, %v4304_v16, %v1659_v3  ;;  %v1539_v62 = vmul.f32 %v3496_v56, %v3533_v13  ;;  %v1576_v6 = vmul.f32 %v3488_v50, %v3490_v4  ;;  %v4421_v42 = vrot.slane %v4420_v47, 2 }
 0x153   : > { %v1465_v30 = vsel %vm1169_vm10, %v1463_v38, %v1464_v32  ;;  %v1577_v51 = vmul.f32 %v3488_v50, %v3533_v13  ;;  %v1701_v52 = vmul.f32 %v3515_v44, %v3490_v4  ;;  %v1702_v7 = vmul.f32 %v3515_v44, %v3533_v13 }
 0x154   : > { %v1467_v54 = vsel %vm1169_vm10, %v1464_v32, %v4421_v42  ;;  %v1516_v15 = vadd.f32 %v1465_v30, %v1391_v21  ;;  %v1626_v3 = vrot.slane %v1576_v6, 1  ;;  %v867_v38 = vadd.f32 %v3077_v28, %v3653_v46  ;;  %v4423_v30 = vld [vmem:[#allocation6_spill] sm:$0xff] }
 0x155   : > { %v1517_v55 = vadd.f32 %v1467_v54, %v1392_v24  ;;  %v1627_v9 = vrot.slane %v1577_v51, 1  ;;  %v1751_v10 = vrot.slane %v1701_v52, 2  ;;  %v868_v32 = vadd.f32 %v3077_v28, %v3663_v27  ;;  %v4424_v51 = vld [vmem:[#allocation5_spill] sm:$0xff] }
 0x156   : > { %v1554_v47 = vadd.f32 %v1538_v8, %v1516_v15  ;;  %v1752_v20 = vrot.slane %v1702_v7, 2  ;;  %v978_v16 = vmul.f32 %v3272_v17, %v3417_v40  ;;  %v4422_v24 = vrot.slane %v3562_v49, 1 }
 0x157   : > { %v1555_v42 = vadd.f32 %v1539_v62, %v1517_v55  ;;  %v1628_v21 = vsel %vm1043_vm1, %v1626_v3, %v1627_v9  ;;  %v897_v54 = vadd.f32 %v867_v38, %v4423_v30  ;;  %v898_v52 = vadd.f32 %v868_v32, %v4424_v51 }
 0x158   : > { %v1630_v6 = vsel %vm1043_vm1, %v1627_v9, %v4422_v24  ;;  %v1679_v46 = vadd.f32 %v1628_v21, %v1554_v47  ;;  %v1753_v28 = vsel %vm1169_vm10, %v1751_v10, %v1752_v20  ;;  %v4425_v27 = vrot.slane %v3566_v22, 2 }
 0x159   : > { %v1680_v41 = vadd.f32 %v1630_v6, %v1555_v42  ;;  %v927_v8 = vmax.f32 %v897_v54, 0.0  ;;  %v928_v62 = vmax.f32 %v898_v52, 0.0  ;;  %v979_v15 = vmul.f32 %v3272_v17, %v3436_v58  ;;  %v4426_v52 = vld [vmem:[#allocation16_spill] sm:$0xff] }
 0x15a   : > { %v1755_v7 = vsel %vm1169_vm10, %v1752_v20, %v4425_v27  ;;  %v1001_v49 = vmul.f32 %v3229_v5, %v3417_v40  ;;  %v1804_v9 = vadd.f32 %v1753_v28, %v1679_v46  ;;  %v1002_v3 = vmul.f32 %v3229_v5, %v3436_v58 }
 0x15b   : > { %v1805_v55 = vadd.f32 %v1755_v7, %v1680_v41  ;;  %v1127_v10 = vmul.f32 %v3252_v11, %v3417_v40  ;;  %v3783_v38 = vmin.f32 %v927_v8, 6.0  ;;  %v3785_v22 = vmin.f32 %v928_v62, 6.0  ;;  %v4428_v62 = vld [vmem:[#allocation17_spill] sm:$0xff] }
 0x15c   : > { %v1054_v20 = vrot.slane %v1001_v49, 1  ;;  %v1128_v32 = vmul.f32 %v3252_v11, %v3436_v58  ;;  %v1827_v47 = vadd.f32 %v3595_v63, %v1804_v9  ;;  %v1055_v21 = vrot.slane %v1002_v3, 1 }
 0x15d   : > { %v1828_v42 = vadd.f32 %v3595_v63, %v1805_v55  ;;  %v1180_v41 = vrot.slane %v1127_v10, 2  ;;  %v1252_v6 = vmul.f32 %v3432_v31, %v3490_v4  ;;  %v1253_v40 = vmul.f32 %v3432_v31, %v3533_v13 }
 0x15e   : > { %v1181_v24 = vrot.slane %v1128_v32, 2  ;;  %v1291_v30 = vmul.f32 %v3311_v60, %v3490_v4  ;;  %v1843_v54 = vmax.f32 %v1827_v47, 0.0  ;;  %v1056_v58 = vsel %vm1043_vm1, %v1054_v20, %v1055_v21 }
 0x15f   : > { %v1844_v51 = vmax.f32 %v1828_v42, 0.0  ;;  %v4427_v46 = vrot.slane %v4426_v52, 1  ;;  %v1104_v27 = vadd.f32 %v1056_v58, %v978_v16  ;;  %v4429_v49 = vrot.slane %v4428_v62, 2 }
 0x160   : > { %v1182_v8 = vsel %vm1169_vm10, %v1180_v41, %v1181_v24  ;;  %v1859_v55 = vmin.f32 %v1843_v54, 6.0  ;;  %v1292_v10 = vmul.f32 %v3311_v60, %v3533_v13  ;;  %v1343_v32 = vrot.slane %v1291_v30, 1  ;;  %v4430_v41 = vld [vmem:[#allocation21_spill] sm:$0xff] }
 0x161   : > { %v1058_v28 = vsel %vm1043_vm1, %v1055_v21, %v4427_v46  ;;  %v1184_v9 = vsel %vm1169_vm10, %v1181_v24, %v4429_v49  ;;  %v1860_v3 = vmin.f32 %v1844_v51, 6.0  ;;  %v1230_v47 = vadd.f32 %v1182_v8, %v1104_v27 }
 0x162   : > { %v1105_v7 = vadd.f32 %v1058_v28, %v979_v15  ;;  %v1416_v42 = vmul.f32 %v3394_v59, %v3490_v4  ;;  %v1417_v16 = vmul.f32 %v3394_v59, %v3533_v13  ;;  %v1344_v21 = vrot.slane %v1292_v10, 1 }
 0x163   : > { %v1874_v15 = vpack.c.bf16 %v1860_v3, %v1859_v55  ;;  %v1418_v58 = vmul.f32 %v3394_v59, %v4430_v41  ;;  %v1540_v24 = vmul.f32 %v3496_v56, %v3574_v29  ;;  %v1268_v54 = vadd.f32 %v1252_v6, %v1230_v47 }
 0x164   : > { %v1231_v20 = vadd.f32 %v1184_v9, %v1105_v7  ;;  %v1468_v52 = vrot.slane %v1416_v42, 2  ;;  %v1469_v30 = vrot.slane %v1417_v16, 2  ;;  %v1345_v46 = vsel %vm1043_vm1, %v1343_v32, %v1344_v21 }
 0x165   : > { %2479 = vmatmul.mubr.bf16.vlgmr.msra.gmra.mrb[20].mxu1 %v1874_v15  ;;  %v4431_v28 = vrot.slane %v3558_v61, 1  ;;  %v1471_v7 = vrot.slane %v1418_v58, 2  ;;  %v1541_v8 = vmul.f32 %v3496_v56, %v3582_v45  ;;  %v1393_v62 = vadd.f32 %v1345_v46, %v1268_v54 }
 0x166   : > { %v1269_v51 = vadd.f32 %v1253_v40, %v1231_v20  ;;  %v1470_v9 = vsel %vm1169_vm10, %v1468_v52, %v1469_v30  ;;  %v1579_v6 = vmul.f32 %v3488_v50, %v3574_v29  ;;  %v1580_v55 = vmul.f32 %v3488_v50, %v3582_v45 }
 0x167   : > { %v1347_v27 = vsel %vm1043_vm1, %v1344_v21, %v4431_v28  ;;  %v1472_v40 = vsel %vm1169_vm10, %v1469_v30, %v1471_v7  ;;  %v1581_v61 = vmul.f32 %v3488_v50, %v3604_v36  ;;  %v1704_v3 = vmul.f32 %v3515_v44, %v3574_v29 }
 0x168   : > { %v1394_v49 = vadd.f32 %v1347_v27, %v1269_v51  ;;  %v1518_v10 = vadd.f32 %v1470_v9, %v1393_v62  ;;  %v1631_v47 = vrot.slane %v1579_v6, 1  ;;  %v1705_v20 = vmul.f32 %v3515_v44, %v3582_v45 }
 0x169   : > { %v1632_v42 = vrot.slane %v1580_v55, 1  ;;  %v1634_v16 = vrot.slane %v1581_v61, 1  ;;  %v1706_v15 = vmul.f32 %v3515_v44, %v3604_v36  ;;  %v1756_v21 = vrot.slane %v1704_v3, 2 }
 0x16a   : > { %v1519_v32 = vadd.f32 %v1472_v40, %v1394_v49  ;;  %v1556_v41 = vadd.f32 %v1540_v24, %v1518_v10  ;;  %v1757_v54 = vrot.slane %v1705_v20, 2  ;;  %v980_v51 = vmul.f32 %v3272_v17, %v3490_v4 }
 0x16b   : > { %v1633_v52 = vsel %vm1043_vm1, %v1631_v47, %v1632_v42  ;;  %v1635_v30 = vsel %vm1043_vm1, %v1632_v42, %v1634_v16  ;;  %v1759_v46 = vrot.slane %v1706_v15, 2  ;;  %v981_v28 = vmul.f32 %v3272_v17, %v3533_v13  ;;  %v4432_v42 = vld [vmem:[#allocation22_spill] sm:$0xff] }
 0x16c   : > { %v1557_v58 = vadd.f32 %v1541_v8, %v1519_v32  ;;  %v1681_v27 = vadd.f32 %v1633_v52, %v1556_v41  ;;  %v1758_v62 = vsel %vm1169_vm10, %v1756_v21, %v1757_v54  ;;  %v1004_v24 = vmul.f32 %v3229_v5, %v3490_v4  ;;  %v4434_v41 = vld [vmem:[#allocation23_spill] sm:$0xff] }
 0x16d   : > { %v1760_v8 = vsel %vm1169_vm10, %v1757_v54, %v1759_v46  ;;  %v1005_v49 = vmul.f32 %v3229_v5, %v3533_v13  ;;  %v1130_v9 = vmul.f32 %v3252_v11, %v3490_v4  ;;  %v1131_v6 = vmul.f32 %v3252_v11, %v3533_v13 }
 0x16e   : > { %v1682_v7 = vadd.f32 %v1635_v30, %v1557_v58  ;;  %v1806_v40 = vadd.f32 %v1758_v62, %v1681_v27  ;;  %v1059_v55 = vrot.slane %v1004_v24, 1  ;;  %v1254_v61 = vmul.f32 %v3432_v31, %v3574_v29 }
 0x16f   : > { %v1060_v3 = vrot.slane %v1005_v49, 1  ;;  %v1185_v10 = vrot.slane %v1130_v9, 2  ;;  %v1186_v32 = vrot.slane %v1131_v6, 2  ;;  %v1255_v47 = vmul.f32 %v3432_v31, %v3582_v45 }
 0x170   : > { %v1807_v17 = vadd.f32 %v1760_v8, %v1682_v7  ;;  %v1829_v5 = vadd.f32 %v3595_v63, %v1806_v40  ;;  %v1294_v4 = vmul.f32 %v3311_v60, %v3574_v29  ;;  %v1295_v11 = vmul.f32 %v3311_v60, %v3582_v45 }
 0x171   : > { %v1061_v13 = vsel %vm1043_vm1, %v1059_v55, %v1060_v3  ;;  %v4433_v16 = vrot.slane %v4432_v42, 1  ;;  %v1187_v21 = vsel %vm1169_vm10, %v1185_v10, %v1186_v32  ;;  %v4435_v58 = vrot.slane %v4434_v41, 2 }
 0x172   : > { %v1830_v20 = vadd.f32 %v3595_v63, %v1807_v17  ;;  %v1845_v52 = vmax.f32 %v1829_v5, 0.0  ;;  %v1106_v46 = vadd.f32 %v1061_v13, %v980_v51  ;;  %v1348_v7 = vrot.slane %v1294_v4, 1 }
 0x173   : > { %v1063_v15 = vsel %vm1043_vm1, %v1060_v3, %v4433_v16  ;;  %v1189_v54 = vsel %vm1169_vm10, %v1186_v32, %v4435_v58  ;;  %v1349_v62 = vrot.slane %v1295_v11, 1  ;;  %v1419_v60 = vmul.f32 %v3394_v59, %v3574_v29 }
 0x174   : > { %v1846_v30 = vmax.f32 %v1830_v20, 0.0  ;;  %v1107_v27 = vadd.f32 %v1063_v15, %v981_v28  ;;  %v1420_v24 = vmul.f32 %v3394_v59, %v3582_v45  ;;  %v1861_v8 = vmin.f32 %v1845_v52, 6.0 }
 0x175   : > { %v1232_v9 = vadd.f32 %v1187_v21, %v1106_v46  ;;  %v1350_v40 = vsel %vm1043_vm1, %v1348_v7, %v1349_v62  ;;  %v4436_v17 = vrot.slane %v3623_v57, 1  ;;  %v1421_v51 = vmul.f32 %v3394_v59, %v3604_v36  ;;  %v3900_v7 = vld [vmem:[%s4270_s3] ss:$0 sm:$0xff] }
 0x176   : > { %v1862_v49 = vmin.f32 %v1846_v30, 6.0  ;;  %v1233_v6 = vadd.f32 %v1189_v54, %v1107_v27  ;;  %v1473_v28 = vrot.slane %v1419_v60, 2  ;;  %v1474_v5 = vrot.slane %v1420_v24, 2 }
 0x177   : > { %v1352_v55 = vsel %vm1043_vm1, %v1349_v62, %v4436_v17  ;;  %v1270_v10 = vadd.f32 %v1254_v61, %v1232_v9  ;;  %v1476_v20 = vrot.slane %v1421_v51, 2  ;;  %v1542_v4 = vmul.f32 %v3496_v56, %v3625_v43  ;;  %v3911_v17 = vld [vmem:[%s4270_s3 + $0x1] ss:$0 sm:$0xff] }
 0x178   : > { %v1875_v3 = vpack.c.bf16 %v1862_v49, %v1861_v8  ;;  %v1271_v32 = vadd.f32 %v1255_v47, %v1233_v6  ;;  %v1543_v11 = vmul.f32 %v3496_v56, %v3704_v2  ;;  %v1582_v57 = vmul.f32 %v3488_v50, %v3625_v43 }
 0x179   : > { %v1395_v13 = vadd.f32 %v1350_v40, %v1270_v10  ;;  %v1475_v36 = vsel %vm1169_vm10, %v1473_v28, %v1474_v5  ;;  %v1583_v61 = vmul.f32 %v3488_v50, %v3704_v2  ;;  %v1477_v47 = vsel %vm1169_vm10, %v1474_v5, %v1476_v20  ;;  %v3922_v20 = vld [vmem:[%s4270_s3 + $0x2] ss:$0 sm:$0xff] }
 0x17a   : > { %2482 = vmatprep.mubr.bf16.mxu1 %v1875_v3  ;;  %v1396_v42 = vadd.f32 %v1352_v55, %v1271_v32  ;;  %v1584_v16 = vmul.f32 %v3488_v50, %v3706_v37  ;;  %v1636_v15 = vrot.slane %v1582_v57, 1  ;;  %v1707_v21 = vmul.f32 %v3515_v44, %v3625_v43 }
 0x17b   : > { %v1520_v41 = vadd.f32 %v1475_v36, %v1395_v13  ;;  %v1637_v54 = vrot.slane %v1583_v61, 1  ;;  %v1708_v52 = vmul.f32 %v3515_v44, %v3704_v2  ;;  %v1709_v46 = vmul.f32 %v3515_v44, %v3706_v37 }
 0x17c   : > { %v1521_v58 = vadd.f32 %v1477_v47, %v1396_v42  ;;  %v1639_v30 = vrot.slane %v1584_v16, 1  ;;  %v1761_v27 = vrot.slane %v1707_v21, 2  ;;  %v982_v62 = vmul.f32 %v3900_v7, %v3574_v29 }
 0x17d   : > { %v1558_v60 = vadd.f32 %v1542_v4, %v1520_v41  ;;  %v1638_v8 = vsel %vm1043_vm1, %v1636_v15, %v1637_v54  ;;  %v1762_v49 = vrot.slane %v1708_v52, 2  ;;  %v1764_v6 = vrot.slane %v1709_v46, 2  ;;  %v3935_v15 = vld [vmem:[%s4270_s3 + $0x5] ss:$0 sm:$0xff] }
 0x17e   : > { %v1559_v24 = vadd.f32 %v1543_v11, %v1521_v58  ;;  %v1640_v9 = vsel %vm1043_vm1, %v1637_v54, %v1639_v30  ;;  %v983_v40 = vmul.f32 %v3900_v7, %v3582_v45  ;;  %v1007_v55 = vmul.f32 %v3911_v17, %v3574_v29 }
 0x17f   : > { %v1683_v51 = vadd.f32 %v1638_v8, %v1558_v60  ;;  %v1763_v3 = vsel %vm1169_vm10, %v1761_v27, %v1762_v49  ;;  %v1008_v10 = vmul.f32 %v3911_v17, %v3582_v45  ;;  %v1765_v32 = vsel %vm1169_vm10, %v1762_v49, %v1764_v6  ;;  %v4438_v27 = vld [vmem:[#allocation24_spill] sm:$0xff] }
 0x180   : > { %v1684_v28 = vadd.f32 %v1640_v9, %v1559_v24  ;;  %v1064_v5 = vrot.slane %v1007_v55, 1  ;;  %v1133_v4 = vmul.f32 %v3922_v20, %v3574_v29  ;;  %v1134_v11 = vmul.f32 %v3922_v20, %v3582_v45 }
 0x181   : > { %v1808_v57 = vadd.f32 %v1763_v3, %v1683_v51  ;;  %v1065_v42 = vrot.slane %v1008_v10, 1  ;;  %v1256_v36 = vmul.f32 %v3432_v31, %v3625_v43  ;;  %v1257_v16 = vmul.f32 %v3432_v31, %v3704_v2 }
 0x182   : > { %v1809_v13 = vadd.f32 %v1765_v32, %v1684_v28  ;;  %v1190_v61 = vrot.slane %v1133_v4, 2  ;;  %v1191_v47 = vrot.slane %v1134_v11, 2  ;;  %v1297_v29 = vmul.f32 %v3935_v15, %v3625_v43 }
 0x183   : > { %v1831_v45 = vadd.f32 %v3595_v63, %v1808_v57  ;;  %v1066_v41 = vsel %vm1043_vm1, %v1064_v5, %v1065_v42  ;;  %v4437_v58 = vrot.slane %v3615_v34, 1  ;;  %v4439_v60 = vrot.slane %v4438_v27, 2 }
 0x184   : > { %v1832_v21 = vadd.f32 %v3595_v63, %v1809_v13  ;;  %v1108_v52 = vadd.f32 %v1066_v41, %v982_v62  ;;  %v1192_v46 = vsel %vm1169_vm10, %v1190_v61, %v1191_v47  ;;  %v1298_v9 = vmul.f32 %v3935_v15, %v3704_v2  ;;  %v4440_v41 = vld [vmem:[#allocation7_spill] sm:$0xff] }
 0x185   : > { %v1068_v54 = vsel %vm1043_vm1, %v1065_v42, %v4437_v58  ;;  %v1194_v24 = vsel %vm1169_vm10, %v1191_v47, %v4439_v60  ;;  %v1847_v8 = vmax.f32 %v1831_v45, 0.0  ;;  %v1353_v6 = vrot.slane %v1297_v29, 1 }
 0x186   : > { %v1109_v30 = vadd.f32 %v1068_v54, %v983_v40  ;;  %v1848_v49 = vmax.f32 %v1832_v21, 0.0  ;;  %v1234_v55 = vadd.f32 %v1192_v46, %v1108_v52  ;;  %v1422_v34 = vmul.f32 %v3394_v59, %v3625_v43 }
 0x187   : > { %v1423_v62 = vmul.f32 %v3394_v59, %v3704_v2  ;;  %v1863_v40 = vmin.f32 %v1847_v8, 6.0  ;;  %v1354_v3 = vrot.slane %v1298_v9, 1  ;;  %v1424_v10 = vmul.f32 %v3394_v59, %v3706_v37 }
 0x188   : > { %v1235_v51 = vadd.f32 %v1194_v24, %v1109_v30  ;;  %v1864_v28 = vmin.f32 %v1848_v49, 6.0  ;;  %v1272_v32 = vadd.f32 %v1256_v36, %v1234_v55  ;;  %v1478_v4 = vrot.slane %v1422_v34, 2 }
 0x189   : > { %v1479_v11 = vrot.slane %v1423_v62, 2  ;;  %v1355_v13 = vsel %vm1043_vm1, %v1353_v6, %v1354_v3  ;;  %v1357_v42 = vsel %vm1043_vm1, %v1354_v3, %v1356_v19  ;;  %v1481_v61 = vrot.slane %v1424_v10, 2 }
 0x18a   : > { %v1273_v5 = vadd.f32 %v1257_v16, %v1235_v51  ;;  %v1876_v57 = vpack.c.bf16 %v1864_v28, %v1863_v40  ;;  %v1397_v47 = vadd.f32 %v1355_v13, %v1272_v32  ;;  %v1544_v21 = vmul.f32 %v3496_v56, %v3783_v38 }
 0x18b   : > { %v1480_v45 = vsel %vm1169_vm10, %v1478_v4, %v1479_v11  ;;  %v1482_v59 = vsel %vm1169_vm10, %v1479_v11, %v1481_v61  ;;  %v1545_v37 = vmul.f32 %v3496_v56, %v3785_v22  ;;  %v1585_v36 = vmul.f32 %v3488_v50, %v3783_v38 }
 0x18c   : > { %v1398_v29 = vadd.f32 %v1357_v42, %v1273_v5  ;;  %2483 = vmatmul.mubr.bf16.gmra.mrb[24].mxu1 %v1876_v57  ;;  %v1586_v33 = vmul.f32 %v3488_v50, %v3785_v22  ;;  %v1522_v19 = vadd.f32 %v1480_v45, %v1397_v47  ;;  %v1587_v58 = vmul.f32 %v3488_v50, %v4440_v41 }
 0x18d   : > { %v1710_v54 = vmul.f32 %v3515_v44, %v3783_v38  ;;  %v1641_v52 = vrot.slane %v1585_v36, 1  ;;  %v1711_v46 = vmul.f32 %v3515_v44, %v3785_v22  ;;  %v1712_v27 = vmul.f32 %v3515_v44, %v4440_v41 }
 0x18e   : > { %v1523_v16 = vadd.f32 %v1482_v59, %v1398_v29  ;;  %v1642_v30 = vrot.slane %v1586_v33, 1  ;;  %v1560_v60 = vadd.f32 %v1544_v21, %v1522_v19  ;;  %v1644_v8 = vrot.slane %v1587_v58, 1 }
 0x18f   : > { %v1766_v49 = vrot.slane %v1710_v54, 2  ;;  %v1767_v6 = vrot.slane %v1711_v46, 2  ;;  %v1769_v55 = vrot.slane %v1712_v27, 2  ;;  %v984_v51 = vmul.f32 %v3900_v7, %v3625_v43 }
 0x190   : > { %v1561_v24 = vadd.f32 %v1545_v37, %v1523_v16  ;;  %v1643_v9 = vsel %vm1043_vm1, %v1641_v52, %v1642_v30  ;;  %v1645_v34 = vsel %vm1043_vm1, %v1642_v30, %v1644_v8  ;;  %v985_v40 = vmul.f32 %v3900_v7, %v3704_v2 }
 0x191   : > { %v1685_v62 = vadd.f32 %v1643_v9, %v1560_v60  ;;  %v1010_v28 = vmul.f32 %v3911_v17, %v3625_v43  ;;  %v1768_v10 = vsel %vm1169_vm10, %v1766_v49, %v1767_v6  ;;  %v1770_v32 = vsel %vm1169_vm10, %v1767_v6, %v1769_v55  ;;  %v4442_v6 = vld [vmem:[#allocation10_spill] sm:$0xff] }
 0x192   : > { %v1686_v3 = vadd.f32 %v1645_v34, %v1561_v24  ;;  %v1011_v5 = vmul.f32 %v3911_v17, %v3704_v2  ;;  %v1136_v57 = vmul.f32 %v3922_v20, %v3625_v43  ;;  %v1137_v13 = vmul.f32 %v3922_v20, %v3704_v2 }
 0x193   : > { %v1810_v4 = vadd.f32 %v1768_v10, %v1685_v62  ;;  %v1069_v11 = vrot.slane %v1010_v28, 1  ;;  %v1258_v47 = vmul.f32 %v3432_v31, %v3783_v38  ;;  %v1259_v29 = vmul.f32 %v3432_v31, %v3785_v22 }
 0x194   : > { %v1811_v42 = vadd.f32 %v1770_v32, %v1686_v3  ;;  %v1070_v61 = vrot.slane %v1011_v5, 1  ;;  %v1195_v21 = vrot.slane %v1136_v57, 2  ;;  %v1196_v59 = vrot.slane %v1137_v13, 2  ;;  %v4444_v32 = vld [vmem:[#allocation11_spill] sm:$0xff] }
 0x195   : > { %v1833_v45 = vadd.f32 %v3595_v63, %v1810_v4  ;;  %v1300_v37 = vmul.f32 %v3935_v15, %v3783_v38  ;;  %v1301_v33 = vmul.f32 %v3935_v15, %v3785_v22  ;;  %v4441_v52 = vrot.slane %v3724_v0, 2  ;;  %v4445_v4 = vld [vmem:[#allocation12_spill] sm:$0xff] }
 0x196   : > { %v1834_v43 = vadd.f32 %v3595_v63, %v1811_v42  ;;  %v1071_v36 = vsel %vm1043_vm1, %v1069_v11, %v1070_v61  ;;  %v1073_v2 = vsel %vm1043_vm1, %v1070_v61, %v1072_v35  ;;  %v1197_v58 = vsel %vm1169_vm10, %v1195_v21, %v1196_v59  ;;  %v4016_v35 = vld [vmem:[%s4270_s3 + $0x6] ss:$0 sm:$0xff] }
 0x197   : > { %v1849_v19 = vmax.f32 %v1833_v45, 0.0  ;;  %v1110_v31 = vadd.f32 %v1071_v36, %v984_v51  ;;  %v1111_v16 = vadd.f32 %v1073_v2, %v985_v40  ;;  %v1199_v30 = vsel %vm1169_vm10, %v1196_v59, %v4441_v52 }
 0x198   : > { %v1850_v54 = vmax.f32 %v1834_v43, 0.0  ;;  %v1358_v46 = vrot.slane %v1300_v37, 1  ;;  %v1359_v27 = vrot.slane %v1301_v33, 1  ;;  %v1425_v8 = vmul.f32 %v4016_v35, %v3783_v38 }
 0x199   : > { %v1865_v60 = vmin.f32 %v1849_v19, 6.0  ;;  %v1236_v24 = vadd.f32 %v1197_v58, %v1110_v31  ;;  %v1237_v18 = vadd.f32 %v1199_v30, %v1111_v16  ;;  %v4443_v0 = vrot.slane %v4442_v6, 1 }
 0x19a   : > { %v1866_v49 = vmin.f32 %v1850_v54, 6.0  ;;  %v1360_v9 = vsel %vm1043_vm1, %v1358_v46, %v1359_v27  ;;  %v1426_v51 = vmul.f32 %v4016_v35, %v3785_v22  ;;  %v1427_v40 = vmul.f32 %v4016_v35, %v4440_v41 }
 0x19b   : > { %v1362_v55 = vsel %vm1043_vm1, %v1359_v27, %v4443_v0  ;;  %v1274_v34 = vadd.f32 %v1258_v47, %v1236_v24  ;;  %v1275_v62 = vadd.f32 %v1259_v29, %v1237_v18  ;;  %v1483_v28 = vrot.slane %v1425_v8, 2  ;;  %v4446_v29 = vld [vmem:[#allocation13_spill] sm:$0xff] }
 0x19c   : > { %v1877_v3 = vpack.c.bf16 %v1866_v49, %v1865_v60  ;;  %v1484_v10 = vrot.slane %v1426_v51, 2  ;;  %v1546_v5 = vmul.f32 %v3496_v56, %v4444_v32  ;;  %v1547_v11 = vmul.f32 %v3496_v56, %v4445_v4 }
 0x19d   : > { %v1399_v57 = vadd.f32 %v1360_v9, %v1274_v34  ;;  %v1400_v13 = vadd.f32 %v1362_v55, %v1275_v62  ;;  %v1486_v42 = vrot.slane %v1427_v40, 2  ;;  %v1588_v61 = vmul.f32 %v3488_v50, %v4444_v32 }
 0x19e   : > { %2486 = vmatprep.mubr.bf16.mxu1 %v1877_v3  ;;  %v1485_v47 = vsel %vm1169_vm10, %v1483_v28, %v1484_v10  ;;  %v1589_v41 = vmul.f32 %v3488_v50, %v4445_v4  ;;  %v1590_v45 = vmul.f32 %v3488_v50, %v4446_v29  ;;  %v1713_v21 = vmul.f32 %v3515_v44, %v4444_v32 }
 0x19f   : > { %v1487_v56 = vsel %vm1169_vm10, %v1484_v10, %v1486_v42  ;;  %v1524_v59 = vadd.f32 %v1485_v47, %v1399_v57  ;;  %v1646_v37 = vrot.slane %v1588_v61, 1  ;;  %v1714_v43 = vmul.f32 %v3515_v44, %v4445_v4 }
 0x1a0   : > { %v1525_v36 = vadd.f32 %v1487_v56, %v1400_v13  ;;  %v1647_v2 = vrot.slane %v1589_v41, 1  ;;  %v1649_v33 = vrot.slane %v1590_v45, 1  ;;  %v1715_v19 = vmul.f32 %v3515_v44, %v4446_v29 }
 0x1a1   : > { %v1562_v31 = vadd.f32 %v1546_v5, %v1524_v59  ;;  %v1771_v16 = vrot.slane %v1713_v21, 2  ;;  %v1772_v58 = vrot.slane %v1714_v43, 2  ;;  %v986_v50 = vmul.f32 %v3900_v7, %v3783_v38  ;;  %v4447_v5 = vld [vmem:[#allocation8_spill] sm:$0xff]  ;;  %v4449_v21 = vld [vmem:[#allocation9_spill] sm:$0xff] }
 0x1a2   : > { %v1563_v54 = vadd.f32 %v1547_v11, %v1525_v36  ;;  %v1648_v52 = vsel %vm1043_vm1, %v1646_v37, %v1647_v2  ;;  %v1650_v30 = vsel %vm1043_vm1, %v1647_v2, %v1649_v33  ;;  %v1774_v46 = vrot.slane %v1715_v19, 2  ;;  %v4451_v19 = vld [vmem:[#allocation14_spill] sm:$0xff] }
 0x1a3   : > { %v1687_v27 = vadd.f32 %v1648_v52, %v1562_v31  ;;  %v1773_v60 = vsel %vm1169_vm10, %v1771_v16, %v1772_v58  ;;  %v987_v24 = vmul.f32 %v3900_v7, %v3785_v22  ;;  %v1013_v44 = vmul.f32 %v3911_v17, %v3783_v38  ;;  %v2586_v7 = vld [vmem:[%s4270_s3 + $0x4] ss:$0 sm:$0xff] }
 0x1a4   : > { %v1688_v18 = vadd.f32 %v1650_v30, %v1563_v54  ;;  %v1775_v8 = vsel %vm1169_vm10, %v1772_v58, %v1774_v46  ;;  %v1014_v49 = vmul.f32 %v3911_v17, %v3785_v22  ;;  %v1139_v9 = vmul.f32 %v3922_v20, %v3783_v38 }
 0x1a5   : > { %v1812_v6 = vadd.f32 %v1773_v60, %v1687_v27  ;;  %v1074_v0 = vrot.slane %v1013_v44, 1  ;;  %v1140_v55 = vmul.f32 %v3922_v20, %v3785_v22  ;;  %v1260_v51 = vmul.f32 %v2586_v7, %v4444_v32  ;;  %v4453_v60 = vld [vmem:[#allocation15_spill] sm:$0xff] }
 0x1a6   : > { %v1813_v34 = vadd.f32 %v1775_v8, %v1688_v18  ;;  %v1075_v62 = vrot.slane %v1014_v49, 1  ;;  %v1200_v40 = vrot.slane %v1139_v9, 2  ;;  %v1261_v28 = vmul.f32 %v2586_v7, %v4445_v4 }
 0x1a7   : > { %v1835_v17 = vadd.f32 %v3595_v63, %v1812_v6  ;;  %v1201_v3 = vrot.slane %v1140_v55, 2  ;;  %v1303_v38 = vmul.f32 %v3935_v15, %v4444_v32  ;;  %v1304_v22 = vmul.f32 %v3935_v15, %v4445_v4 }
 0x1a8   : > { %v1836_v20 = vadd.f32 %v3595_v63, %v1813_v34  ;;  %v1076_v10 = vsel %vm1043_vm1, %v1074_v0, %v1075_v62  ;;  %v4448_v11 = vrot.slane %v4447_v5, 1  ;;  %v1428_v13 = vmul.f32 %v4016_v35, %v4444_v32  ;;  %v2589_v0 = vld [vmem:[%s4270_s3 + $0xa] ss:$0 sm:$0xff] }
 0x1a9   : > { %v1851_v42 = vmax.f32 %v1835_v17, 0.0  ;;  %v1112_v61 = vadd.f32 %v1076_v10, %v986_v50  ;;  %v1202_v41 = vsel %vm1169_vm10, %v1200_v40, %v1201_v3  ;;  %v4450_v56 = vrot.slane %v4449_v21, 2 }
 0x1aa   : > { %v1078_v57 = vsel %vm1043_vm1, %v1075_v62, %v4448_v11  ;;  %v1852_v45 = vmax.f32 %v1836_v20, 0.0  ;;  %v1363_v63 = vrot.slane %v1303_v38, 1  ;;  %v1364_v59 = vrot.slane %v1304_v22, 1 }
 0x1ab   : > { %v1113_v47 = vadd.f32 %v1078_v57, %v987_v24  ;;  %v1204_v15 = vsel %vm1169_vm10, %v1201_v3, %v4450_v56  ;;  %v1867_v37 = vmin.f32 %v1851_v42, 6.0  ;;  %v1238_v43 = vadd.f32 %v1202_v41, %v1112_v61 }
 0x1ac   : > { %v1429_v2 = vmul.f32 %v4016_v35, %v4445_v4  ;;  %v1868_v33 = vmin.f32 %v1852_v45, 6.0  ;;  %v1365_v32 = vsel %vm1043_vm1, %v1363_v63, %v1364_v59  ;;  %v4452_v31 = vrot.slane %v4451_v19, 1  ;;  %v2587_v4 = vld [vmem:[%s4270_s3 + $0x8] ss:$0 sm:$0xff] }
 0x1ad   : > { %v1239_v36 = vadd.f32 %v1204_v15, %v1113_v47  ;;  %v1430_v58 = vmul.f32 %v4016_v35, %v4446_v29  ;;  %v1276_v50 = vadd.f32 %v1260_v51, %v1238_v43  ;;  %v1488_v52 = vrot.slane %v1428_v13, 2  ;;  %v2588_v35 = vld [vmem:[%s4270_s3 + $0x9] ss:$0 sm:$0xff]  ;;  %v4458_v13 = vld [vmem:[#allocation19_spill] sm:$0xff]  ;;  %v2590_v43 = vld [vmem:[%s4271_s4] ss:$0 sm:$0xff] }
 0x1ae   : > { %v1367_v16 = vsel %vm1043_vm1, %v1364_v59, %v4452_v31  ;;  %v1489_v30 = vrot.slane %v1429_v2, 2  ;;  %v1878_v46 = vpack.c.bf16 %v1868_v33, %v1867_v37  ;;  %v1548_v24 = vmul.f32 %v2587_v4, %v4453_v60 }
 0x1af   : > { %v1277_v54 = vadd.f32 %v1261_v28, %v1239_v36  ;;  %v1491_v27 = vrot.slane %v1430_v58, 2  ;;  %v1549_v44 = vmul.f32 %v2587_v4, %v3464_v12  ;;  %v1401_v18 = vadd.f32 %v1365_v32, %v1276_v50  ;;  %v2067_v4 = vld [vmem:[%s4144_s0 + $0x10] sm:$0xff] }
 0x1b0   : > { %v1490_v49 = vsel %vm1169_vm10, %v1488_v52, %v1489_v30  ;;  %v1591_v29 = vmul.f32 %v2588_v35, %v4453_v60  ;;  %2487 = vmatmul.mubr.bf16.gmra.mrb[28].mxu1 %v1878_v46  ;;  %v1592_v6 = vmul.f32 %v2588_v35, %v3464_v12  ;;  %v1716_v55 = vmul.f32 %v2589_v0, %v4453_v60  ;;  %v4149_v46 = vld [vmem:[%s4273_s6] ss:$0 sm:$0xff] }
 0x1b1   : > { %v1402_v8 = vadd.f32 %v1367_v16, %v1277_v54  ;;  %v1492_v9 = vsel %vm1169_vm10, %v1489_v30, %v1491_v27  ;;  %v1717_v7 = vmul.f32 %v2589_v0, %v3464_v12  ;;  %v1526_v51 = vadd.f32 %v1490_v49, %v1401_v18  ;;  %v2068_v49 = vld [vmem:[%s4144_s0 + $0x18] sm:$0xff] }
 0x1b2   : > { %v1651_v62 = vrot.slane %v1591_v29, 1  ;;  %v4454_v40 = vrot.slane %v3693_v25, 1  ;;  %v4455_v28 = vrot.slane %v3644_v39, 1  ;;  %v1652_v3 = vrot.slane %v1592_v6, 1  ;;  %v2066_v6 = vld [vmem:[%s4144_s0 + $0x8] sm:$0xff] }
 0x1b3   : > { %v1527_v34 = vadd.f32 %v1492_v9, %v1402_v8  ;;  %v1776_v38 = vrot.slane %v1716_v55, 2  ;;  %v1777_v22 = vrot.slane %v1717_v7, 2  ;;  %v1564_v10 = vadd.f32 %v1548_v24, %v1526_v51 }
 0x1b4   : > { %v1658_v17 = vsel %vm1043_vm1, %v4455_v28, %v4454_v40  ;;  %v1692_v11 = vadd.f32 %v3741_v1, %v3708_v48  ;;  %v4456_v12 = vrot.slane %v3696_v23, 2  ;;  %v4457_v57 = vrot.slane %v3647_v53, 2 }
 0x1b5   : > { %v1691_v20 = vadd.f32 %v1658_v17, %v3684_v26  ;;  %v1565_v5 = vadd.f32 %v1549_v44, %v1527_v34  ;;  %v1653_v39 = vsel %vm1043_vm1, %v1651_v62, %v1652_v3  ;;  %v4459_v42 = vrot.slane %v4458_v13, 1  ;;  %v4460_v26 = vld [vmem:[#allocation20_spill] sm:$0xff]  ;;  %v2065_v44 = vld [vmem:[%s4144_s0] sm:$0xff]  ;;  %v2071_v62 = vld [vmem:[%s4144_s0 + $0x30] sm:$0xff] }
 0x1b6   : > { %v1783_v25 = vsel %vm1169_vm10, %v4457_v57, %v4456_v12  ;;  %v1778_v47 = vsel %vm1169_vm10, %v1776_v38, %v1777_v22  ;;  %v4461_v41 = vrot.slane %v4460_v26, 2  ;;  %v1689_v21 = vadd.f32 %v1653_v39, %v1564_v10  ;;  %v2069_v17 = vld [vmem:[%s4144_s0 + $0x20] sm:$0xff] }
 0x1b7   : > { %v1655_v61 = vsel %vm1043_vm1, %v1652_v3, %v4459_v42  ;;  %v4462_v1 = vrot.slane %v3716_v14, 2  ;;  %v4463_v53 = vmov %v4456_v12  ;;  %v1816_v15 = vadd.f32 %v1783_v25, %v1691_v20  ;;  %v2075_v42 = vld [vmem:[%s4144_s0 + $0x50] sm:$0xff]  ;;  %v2073_v26 = vld [vmem:[%s4144_s0 + $0x40] sm:$0xff] }
 0x1b8   : > { %v1780_v45 = vsel %vm1169_vm10, %v1777_v22, %v4461_v41  ;;  %v1690_v48 = vadd.f32 %v1655_v61, %v1565_v5  ;;  %v1814_v59 = vadd.f32 %v1778_v47, %v1689_v21  ;;  %v2072_v22 = vld [vmem:[%s4144_s0 + $0x38] sm:$0xff] }
 0x1b9   : > { %v1785_v56 = vsel %vm1169_vm10, %v4463_v53, %v4462_v1  ;;  %v1839_v36 = vadd.f32 %v2590_v43, %v1816_v15  ;;  %v2076_v21 = vld [vmem:[%s4144_s0 + $0x58] sm:$0xff] }
 0x1ba   : > { %v1817_v63 = vadd.f32 %v1785_v56, %v1692_v11  ;;  %v1815_v37 = vadd.f32 %v1780_v45, %v1690_v48  ;;  %v1837_v33 = vadd.f32 %v2590_v43, %v1814_v59  ;;  %v2070_v11 = vld [vmem:[%s4144_s0 + $0x28] sm:$0xff] }
 0x1bb   : > { %v1855_v14 = vmax.f32 %v1839_v36, 0.0  ;;  %v2074_v56 = vld [vmem:[%s4144_s0 + $0x48] sm:$0xff]  ;;  %v2079_v36 = vld [vmem:[%s4144_s0 + $0x70] sm:$0xff] }
 0x1bc   : > { %v1840_v2 = vadd.f32 %v2590_v43, %v1817_v63  ;;  %v1838_v32 = vadd.f32 %v2590_v43, %v1815_v37  ;;  %v1853_v23 = vmax.f32 %v1837_v33, 0.0 }
 0x1bd   : > { %v1871_v16 = vmin.f32 %v1855_v14, 6.0 }
 0x1be   : > { %v1856_v19 = vmax.f32 %v1840_v2, 0.0  ;;  %v1854_v31 = vmax.f32 %v1838_v32, 0.0  ;;  %v1869_v50 = vmin.f32 %v1853_v23, 6.0  ;;  %v2077_v32 = vld [vmem:[%s4144_s0 + $0x60] sm:$0xff]  ;;  %v2080_v23 = vld [vmem:[%s4144_s0 + $0x78] sm:$0xff] }
 0x1c0   : > { %v1872_v58 = vmin.f32 %v1856_v19, 6.0  ;;  %v1870_v54 = vmin.f32 %v1854_v31, 6.0 }
 0x1c2   : > { %v1880_v52 = vpack.c.bf16 %v1872_v58, %v1871_v16  ;;  %v1879_v30 = vpack.c.bf16 %v1870_v54, %v1869_v50  ;;  %v2078_v50 = vld [vmem:[%s4144_s0 + $0x68] sm:$0xff]  ;;  %s4215_s0 = scalar_lea.sflag [#allocation3], %s409_s20 }
 0x1c4   : > { %2490 = vmatprep.mubr.bf16.mxu1 %v1879_v30 }
 0x1c5   : > { %2491 = vmatmul.mubr.bf16.gmra.mrb[32].mxu1 %v1880_v52 }
 0x238   : > { %v2480_v27 = vpop.f32.mrb[20].mxu1 }
 0x239   : > { %v2051_v60 = vadd.f32 %v2480_v27, %v4149_v46  ;;  %v1979_v24 = vpop.f32.mrb[21].mxu1 }
 0x23a   : > { %v2049_v18 = vadd.f32 %v4149_v46, %v1979_v24  ;;  %v2481_v8 = vpop.f32.mrb[22].mxu1 }
 0x23b   : > { %v2083_v35 = vadd.f32 %v2067_v4, %v2051_v60  ;;  %v2052_v29 = vadd.f32 %v2481_v8, %v4149_v46  ;;  %v1982_v9 = vpop.f32.mrb[23].mxu1 }
 0x23c   : > { %v2081_v0 = vadd.f32 %v2065_v44, %v2049_v18  ;;  %v2050_v55 = vadd.f32 %v4149_v46, %v1982_v9 }
 0x23d   : > { %2099 = vst [vmem:[%s4161_s1 + $0x10] sm:$0xff] %v2083_v35  ;;  %v2084_v7 = vadd.f32 %v2068_v49, %v2052_v29 }
 0x23e   : > { %2097 = vst [vmem:[%s4161_s1] sm:$0xff] %v2081_v0  ;;  %v2082_v51 = vadd.f32 %v2066_v6, %v2050_v55 }
 0x23f   : > { %2100 = vst [vmem:[%s4161_s1 + $0x18] sm:$0xff] %v2084_v7 }
 0x240   : > { %2098 = vst [vmem:[%s4161_s1 + $0x8] sm:$0xff] %v2082_v51 }
 0x25f   : > { %v2484_v34 = vpop.f32.mrb[24].mxu1 }
 0x260   : > { %v2055_v40 = vadd.f32 %v2484_v34, %v4149_v46  ;;  %v1995_v28 = vpop.f32.mrb[25].mxu1 }
 0x261   : > { %v2053_v3 = vadd.f32 %v4149_v46, %v1995_v28  ;;  %v2485_v38 = vpop.f32.mrb[26].mxu1 }
 0x262   : > { %v2087_v20 = vadd.f32 %v2071_v62, %v2055_v40  ;;  %v2056_v10 = vadd.f32 %v2485_v38, %v4149_v46  ;;  %v1998_v5 = vpop.f32.mrb[27].mxu1 }
 0x263   : > { %v2085_v12 = vadd.f32 %v2069_v17, %v2053_v3  ;;  %v2054_v57 = vadd.f32 %v4149_v46, %v1998_v5 }
 0x264   : > { %2103 = vst [vmem:[%s4161_s1 + $0x30] sm:$0xff] %v2087_v20  ;;  %v2088_v25 = vadd.f32 %v2072_v22, %v2056_v10 }
 0x265   : > { %2101 = vst [vmem:[%s4161_s1 + $0x20] sm:$0xff] %v2085_v12  ;;  %v2086_v39 = vadd.f32 %v2070_v11, %v2054_v57 }
 0x266   : > { %2104 = vst [vmem:[%s4161_s1 + $0x38] sm:$0xff] %v2088_v25 }
 0x267   : > { %2102 = vst [vmem:[%s4161_s1 + $0x28] sm:$0xff] %v2086_v39 }
 0x283   : > { %v2488_v13 = vpop.f32.mrb[28].mxu1 }
 0x284   : > { %v2059_v61 = vadd.f32 %v2488_v13, %v4149_v46  ;;  %v2011_v47 = vpop.f32.mrb[29].mxu1 }
 0x285   : > { %v2057_v41 = vadd.f32 %v4149_v46, %v2011_v47  ;;  %v2489_v45 = vpop.f32.mrb[30].mxu1 }
 0x286   : > { %v2091_v48 = vadd.f32 %v2075_v42, %v2059_v61  ;;  %v2060_v1 = vadd.f32 %v2489_v45, %v4149_v46  ;;  %v2014_v53 = vpop.f32.mrb[31].mxu1 }
 0x287   : > { %v2089_v15 = vadd.f32 %v2073_v26, %v2057_v41  ;;  %v2058_v63 = vadd.f32 %v4149_v46, %v2014_v53 }
 0x288   : > { %2107 = vst [vmem:[%s4161_s1 + $0x50] sm:$0xff] %v2091_v48  ;;  %v2092_v59 = vadd.f32 %v2076_v21, %v2060_v1 }
 0x289   : > { %2105 = vst [vmem:[%s4161_s1 + $0x40] sm:$0xff] %v2089_v15  ;;  %v2090_v37 = vadd.f32 %v2074_v56, %v2058_v63 }
 0x28a   : > { %2108 = vst [vmem:[%s4161_s1 + $0x58] sm:$0xff] %v2092_v59 }
 0x28b   : > { %2106 = vst [vmem:[%s4161_s1 + $0x48] sm:$0xff] %v2090_v37 }
 0x298   : > { %v2492_v43 = vpop.f32.mrb[32].mxu1 }
 0x299   : > { %v2063_v2 = vadd.f32 %v2492_v43, %v4149_v46  ;;  %v2027_v33 = vpop.f32.mrb[33].mxu1 }
 0x29a   : > { %v2061_v14 = vadd.f32 %v4149_v46, %v2027_v33  ;;  %v2493_v19 = vpop.f32.mrb[34].mxu1 }
 0x29b   : > { %v2095_v31 = vadd.f32 %v2079_v36, %v2063_v2  ;;  %v2064_v16 = vadd.f32 %v2493_v19, %v4149_v46  ;;  %v2030_v58 = vpop.f32.mrb[35].mxu1 }
 0x29c   : > { %v2093_v54 = vadd.f32 %v2077_v32, %v2061_v14  ;;  %v2062_v52 = vadd.f32 %v4149_v46, %v2030_v58 }
 0x29d   : > { %2111 = vst [vmem:[%s4161_s1 + $0x70] sm:$0xff] %v2095_v31  ;;  %v2096_v30 = vadd.f32 %v2080_v23, %v2064_v16 }
 0x29e   : > { %2109 = vst [vmem:[%s4161_s1 + $0x60] sm:$0xff] %v2093_v54  ;;  %v2094_v27 = vadd.f32 %v2078_v50, %v2062_v52 }
 0x29f   : > { %2112 = vst [vmem:[%s4161_s1 + $0x78] sm:$0xff] %v2096_v30 }
 0x2a0   : > { %2110 = vst [vmem:[%s4161_s1 + $0x68] sm:$0xff] %v2094_v27 }
 0x2a1   : > { %2604 = shalt.err (!%p2601_p7)
}
 0x2a2   : > { %s2605_s20 = scalar_lea.hbm %s4206_s17, 2048  ;;  %s2609_s25 = scalar_lea.hbm %s4275_s8, 8192 }
 0x2a3   : > { %p2606_p9 = scmp.ne.s32.totalorder %s4206_s17, %s2605_s20  ;;  %p2610_p12 = scmp.lt.u32.totalorder %s4206_s17, %s4275_s8 }
 0x2a4   : > { %p2611_p13 = scmp.lt.u32.totalorder %s2609_s25, %s2605_s20  ;;  %p2613_p1 = scmp.lt.u32.totalorder %s2605_s20, %s4206_s17 }
 0x2a5   : > { %p2607_p10 = pnand %p2606_p9, %p2789_p3 }
 0x2a6   : > { %p2612_p0 = por %p2611_p13, %p2610_p12 }
 0x2a7   : > { %p2608_p11 = pneg %p2607_p10 }
 0x2a8   : > { %p2614_p2 = por %p2613_p1, %p2612_p0 }
 0x2aa   : > { %p2615_p4 = pnand %p2614_p2, %p2608_p11 }
 0x2ac   : > { %2618 = shalt.err (!%p2615_p4)
}
 0x2ad   : > { %s2691_s14 = smov 128   ;;  %s2692_s21 = smov 8  }
 0x2ae   : > { %2497 = dma.vmem_to_hbm [thread:$0]  (%p2789_p3), %s4208_s30, 2048, %s4206_s17, %s4215_s0, %s2691_s14, %s2691_s14, %s2692_s21  }
 0x2af PF: > { %p2503_p5 = scmp.ge.s32.totalorder %s2685_s12, 2  ;;  %s2145_s22 = sand.u32 1, %s2657_s27  }
 0x2b0   : > { %s2146_s24 = scalar_lea.sflag [#allocation3], %s2145_s22 }
 0x2b1   : > { %p2500_p6 = pnand %p2503_p5, %p2798_p8 }
 0x2b3   : > { %2652 = dma.done.wait (!%p2500_p6), %s2146_s24, 2048  }
 0x2b4   : > { %2654 = vsyncadd (!%p2500_p6), %s2146_s24, 4294965248  ;;  %s21_s12 = sadd.s32 1, %s2685_s12   ;;  %s4464_s27 = smov %s2661_s28 }
 0x2b5   : > { %p18_p7 = scmp.ge.s32.totalorder %s21_s12, 6   ;;  %s4465_s28 = smov %s2665_s29 }
 0x2b6   : > { %s4466_s29 = smov %s2807_s23  ;;  %s4467_s30 = smov %s2677_s10 }
 0x2b7   : > { %s4468_s9 = smov %s2681_s11  ;;  %s4469_s10 = smov %s4472_s15 }
 0x2b8   : > { %s4470_s11 = smov %s4476_s16  ;;  %20 = sbr.rel (!%p18_p7) target bundleno = 9 (0x9), region = 108 }
 0x2bf   :  { %2151 = vsyncpa [#allocation3], 1 }
 0x2c0   :  { %2153 = vsyncpa [#allocation3 + $0x1], 1 }

</bundles_post_ra>
